<compile_context>
chip_gen: v5e
topology: v5e:2x2
jax: 0.10.0
libtpu: 0.0.40
codegen_flags: <defaults>
</compile_context>

<pallas_src>
import math
import functools

import jax
import jax.numpy as jnp
from jax.experimental import pallas as pl
from jax.experimental.pallas import tpu as pltpu


# ----------------------------- model config (small stand-in) ---------------------
BATCH = 2
SEQ = 8
VOCAB = 64
D_MODEL = 32          # embedding_model.config.hidden_size
NHEAD = 8             # module default
NUM_LAYERS = 2        # small stand-in for num_encoder_layers=6
DIM_FF = 64           # small stand-in for dim_feedforward=1024
NUM_CLASSES = 4
C_PAD = 128           # lane-dense classifier slab width (sliced to NUM_CLASSES outside)
P_PACK = 128          # lane width of the packed per-layer small-params buffer
LN_EPS = 1e-5
NEG_INF = -1e30       # additive key-padding mask value (scores stay f32)

assert D_MODEL % NHEAD == 0
assert 3 * D_MODEL <= P_PACK and DIM_FF <= P_PACK and D_MODEL <= P_PACK


def _layer_norm(t, w, b):
    # PyTorch LayerNorm over last dim (biased variance, eps=1e-5), all f32.
    mu = jnp.mean(t, axis=-1, keepdims=True)
    var = jnp.mean((t - mu) ** 2, axis=-1, keepdims=True)
    return (t - mu) * jax.lax.rsqrt(var + LN_EPS) * w + b


# ----------------------------- fused forward kernel ------------------------------
def fused_forward_kernel(x_ref, bias_ref,
                         wqkv_ref, wo_ref, w1_ref, w2_ref, small_ref,
                         fcw_ref, fcb_ref,
                         out_ref, x_scr, ctx_scr, *, nhead, d_model, dim_ff):
    """Grid = (batch, layer).  x_scr (VMEM) carries activations across layers."""
    layer = pl.program_id(1)
    n_layers = pl.num_programs(1)

    # ---- first layer step for this batch: load pre-added (emb + pe) block ------
    @pl.when(layer == 0)
    def _():
        x_scr[...] = x_ref[...]

    x = x_scr[...]                               # (S, D) f32
    dh = d_model // nhead
    scale = 1.0 / math.sqrt(dh)

    # packed per-layer small params: one (8, 128) tile, sliced by row ------------
    small = small_ref[...]
    bqkv = small[0:1, :3 * d_model]
    bo   = small[1:2, :d_model]
    b1   = small[2:3, :dim_ff]
    b2   = small[3:4, :d_model]
    ln1w = small[4:5, :d_model]
    ln1b = small[5:6, :d_model]
    ln2w = small[6:7, :d_model]
    ln2b = small[7:8, :d_model]

    # ---- multi-head self attention ----------------------------------------------
    # one flattened QKV projection: (S, D) @ (D, 3D), bf16 inputs, f32 accumulate
    qkv = jnp.dot(x.astype(jnp.bfloat16), wqkv_ref[...],
                  preferred_element_type=jnp.float32) + bqkv
    q = (qkv[:, :d_model] * scale).astype(jnp.bfloat16)
    k = qkv[:, d_model:2 * d_model].astype(jnp.bfloat16)
    v = qkv[:, 2 * d_model:].astype(jnp.bfloat16)

    bias = bias_ref[...]                         # (1, S) key-padding additive bias

    # per-head attention (static unroll); bf16 MXU dots, no explicit transpose,
    # head outputs written into the ctx VMEM scratch slab (no lane concat).
    # TODO(synk): at real dims (d_model>=768, seq>=512) switch to an
    # (nhead, S, dh) head-batched einsum and 256-aligned row tiles (v6e/v7x).
    dn = (((1,), (1,)), ((), ()))                # contract the head dim of q and k
    for h in range(nhead):
        sl = slice(h * dh, (h + 1) * dh)
        s = jax.lax.dot_general(q[:, sl], k[:, sl], dn,
                                preferred_element_type=jnp.float32) + bias  # (S, S)
        s = s - jnp.max(s, axis=-1, keepdims=True)
        p = jnp.exp(s)
        p = p * pl.reciprocal(jnp.sum(p, axis=-1, keepdims=True), approx=True)
        ctx_scr[:, sl] = jnp.dot(p.astype(jnp.bfloat16), v[:, sl],
                                 preferred_element_type=jnp.float32)

    attn = jnp.dot(ctx_scr[...].astype(jnp.bfloat16), wo_ref[...],
                   preferred_element_type=jnp.float32) + bo

    # ---- residual + LayerNorm 1 (post-norm, as in nn.TransformerEncoderLayer) ---
    x1 = _layer_norm(x + attn, ln1w, ln1b)

    # ---- feed-forward: Linear -> ReLU -> Linear ----------------------------------
    h1 = jnp.dot(x1.astype(jnp.bfloat16), w1_ref[...],
                 preferred_element_type=jnp.float32) + b1
    h1 = jnp.maximum(h1, 0.0)
    ffn = jnp.dot(h1.astype(jnp.bfloat16), w2_ref[...],
                  preferred_element_type=jnp.float32) + b2

    # ---- residual + LayerNorm 2 ---------------------------------------------------
    x2 = _layer_norm(x1 + ffn, ln2w, ln2b)
    # TODO(synk): on v7x (64 MiB VMEM) store x_scr in bf16 and upcast in LN.
    x_scr[...] = x2

    # ---- final classifier on the last layer step (lane-dense (S, 128) slab) ------
    @pl.when(layer == n_layers - 1)
    def _():
        out_ref[...] = jnp.dot(x2.astype(jnp.bfloat16), fcw_ref[...],
                               preferred_element_type=jnp.float32) + fcb_ref[...]


# ----------------------------- pallas_call wrapper --------------------------------
def transformer_forward(x_in, key_bias, stacked, fc_w_t, fc_b):
    B, S, D = x_in.shape
    L = stacked["wqkv_t"].shape[0]
    FF = stacked["w1_t"].shape[2]

    kernel = functools.partial(fused_forward_kernel,
                               nhead=NHEAD, d_model=D, dim_ff=FF)

    grid_spec = pltpu.PrefetchScalarGridSpec(
        num_scalar_prefetch=0,
        grid=(B, L),
        in_specs=[
            pl.BlockSpec((None, S, D), lambda b, l: (b, 0, 0)),        # emb + pe
            pl.BlockSpec((None, 1, S), lambda b, l: (b, 0, 0)),        # key-pad bias
            pl.BlockSpec((None, D, 3 * D), lambda b, l: (l, 0, 0)),    # wqkv (bf16)
            pl.BlockSpec((None, D, D), lambda b, l: (l, 0, 0)),        # wo   (bf16)
            pl.BlockSpec((None, D, FF), lambda b, l: (l, 0, 0)),       # w1   (bf16)
            pl.BlockSpec((None, FF, D), lambda b, l: (l, 0, 0)),       # w2   (bf16)
            pl.BlockSpec((None, 8, P_PACK), lambda b, l: (l, 0, 0)),   # packed biases/LN
            pl.BlockSpec((D, C_PAD), lambda b, l: (0, 0)),             # fc_w (bf16)
            pl.BlockSpec((1, C_PAD), lambda b, l: (0, 0)),             # fc_b
        ],
        out_specs=pl.BlockSpec((None, S, C_PAD), lambda b, l: (b, 0, 0)),
        scratch_shapes=[pltpu.VMEM((S, D), jnp.float32),   # activations across layers
                        pltpu.VMEM((S, D), jnp.float32)],  # per-layer attention ctx
    )

    return pl.pallas_call(
        kernel,
        out_shape=jax.ShapeDtypeStruct((B, S, C_PAD), jnp.float32),
        grid_spec=grid_spec,
        compiler_params=pltpu.CompilerParams(
            dimension_semantics=("parallel", "arbitrary"),   # batch || , layers seq
            vmem_limit_bytes=32 * 1024 * 1024,               # fits v5e/v6e/v7x budgets
        ),
    )(x_in, key_bias,
      stacked["wqkv_t"], stacked["wo_t"], stacked["w1_t"], stacked["w2_t"],
      stacked["small"], fc_w_t, fc_b)


# ----------------------------- parameter / buffer setup ---------------------------
def make_positional_encoding(seq_len, d_model):
    position = jnp.arange(seq_len, dtype=jnp.float32)[:, None]
    div_term = jnp.exp(jnp.arange(0, d_model, 2, dtype=jnp.float32)
                       * (-math.log(10000.0) / d_model))
    pe = jnp.zeros((seq_len, d_model), dtype=jnp.float32)
    pe = pe.at[:, 0::2].set(jnp.sin(position * div_term))
    pe = pe.at[:, 1::2].set(jnp.cos(position * div_term))
    return pe


def init_params(key):
    keys = jax.random.split(key, 2 + NUM_LAYERS)
    emb_table = jax.random.normal(keys[0], (VOCAB, D_MODEL), jnp.float32) * 0.02

    def one_layer(k):
        ks = jax.random.split(k, 4)
        return dict(
            wqkv=jax.random.normal(ks[0], (3 * D_MODEL, D_MODEL), jnp.float32) * 0.05,
            bqkv=jnp.zeros((3 * D_MODEL,), jnp.float32),
            wo=jax.random.normal(ks[1], (D_MODEL, D_MODEL), jnp.float32) * 0.05,
            bo=jnp.zeros((D_MODEL,), jnp.float32),
            ln1_w=jnp.ones((D_MODEL,), jnp.float32),
            ln1_b=jnp.zeros((D_MODEL,), jnp.float32),
            w1=jax.random.normal(ks[2], (DIM_FF, D_MODEL), jnp.float32) * 0.05,
            b1=jnp.zeros((DIM_FF,), jnp.float32),
            w2=jax.random.normal(ks[3], (D_MODEL, DIM_FF), jnp.float32) * 0.05,
            b2=jnp.zeros((D_MODEL,), jnp.float32),
            ln2_w=jnp.ones((D_MODEL,), jnp.float32),
            ln2_b=jnp.zeros((D_MODEL,), jnp.float32),
        )

    layers = [one_layer(keys[1 + l]) for l in range(NUM_LAYERS)]

    def stack(name):
        return jnp.stack([p[name] for p in layers], axis=0)

    def pad_row(a):
        return jnp.pad(a, (0, P_PACK - a.shape[0]))

    # all per-layer small params packed into a single (L, 8, 128) buffer
    small = jnp.stack([
        jnp.stack([pad_row(p["bqkv"]), pad_row(p["bo"]),
                   pad_row(p["b1"]), pad_row(p["b2"]),
                   pad_row(p["ln1_w"]), pad_row(p["ln1_b"]),
                   pad_row(p["ln2_w"]), pad_row(p["ln2_b"])], axis=0)
        for p in layers], axis=0).astype(jnp.float32)

    # Matmul weights: stacked along [L], pre-transposed to [in, out], bf16.
    stacked = dict(
        wqkv_t=jnp.swapaxes(stack("wqkv"), 1, 2).astype(jnp.bfloat16),  # (L, D, 3D)
        wo_t=jnp.swapaxes(stack("wo"), 1, 2).astype(jnp.bfloat16),      # (L, D, D)
        w1_t=jnp.swapaxes(stack("w1"), 1, 2).astype(jnp.bfloat16),      # (L, D, FF)
        w2_t=jnp.swapaxes(stack("w2"), 1, 2).astype(jnp.bfloat16),      # (L, FF, D)
        small=small,
    )

    fc_w = jax.random.normal(keys[1 + NUM_LAYERS], (NUM_CLASSES, D_MODEL),
                             jnp.float32) * 0.05
    fc_w_t = jnp.zeros((D_MODEL, C_PAD), jnp.float32).at[:, :NUM_CLASSES].set(fc_w.T)
    fc_w_t = fc_w_t.astype(jnp.bfloat16)                                # (D, 128)
    fc_b = jnp.zeros((1, C_PAD), jnp.float32)
    return emb_table, stacked, fc_w_t, fc_b


# ----------------------------- full forward pass ----------------------------------
def forward(input_ids, attention_mask, emb_table, stacked, fc_w_t, fc_b, pe):
    B, S = input_ids.shape

    # --- "embedding_model" stand-in (plain-JAX glue): table lookup
    # TODO(synk): the external HuggingFace embedding_model has no Pallas
    # equivalent; a deterministic embedding-table lookup stands in for it.
    emb = emb_table[input_ids]                                        # (B, S, D)

    # --- layout plumbing (plain JAX, once per forward): positional-encoding add
    #     and per-batch additive key-padding bias (0 valid / -1e30 padded).
    x_in = emb + pe[None, :, :]                                       # (B, S, D)
    key_bias = jnp.where(attention_mask != 0, 0.0, NEG_INF)
    key_bias = key_bias.astype(jnp.float32)[:, None, :]               # (B, 1, S)

    # --- fused Pallas kernel: NUM_LAYERS encoder layers + classifier
    logits_pad = transformer_forward(x_in, key_bias, stacked, fc_w_t, fc_b)
    return logits_pad[:, :, :NUM_CLASSES]                             # (B, S, C)


# ----------------------------- driver ----------------------------------------------
if __name__ == "__main__":
    key = jax.random.PRNGKey(0)
    k_ids, k_params = jax.random.split(key)

    input_ids = jax.random.randint(k_ids, (BATCH, SEQ), 0, VOCAB, dtype=jnp.int32)
    # batch 0 fully valid; batch 1 has the last two tokens padded
    attention_mask = jnp.array([[1] * SEQ,
                                [1] * (SEQ - 2) + [0] * 2], dtype=jnp.int32)

    emb_table, stacked, fc_w_t, fc_b = init_params(k_params)
    pe = make_positional_encoding(SEQ, D_MODEL)

    logits = forward(input_ids, attention_mask, emb_table, stacked, fc_w_t, fc_b, pe)
    logits = jax.block_until_ready(logits)

    assert logits.shape == (BATCH, SEQ, NUM_CLASSES)
    assert bool(jnp.all(jnp.isfinite(logits)))
    print("KERNEL_OK")
</pallas_src>

<mosaic_0001>
module attributes {stable_mosaic.version = 11 : i64} {
  func.func @fused_forward_kernel(%arg0: i32, %arg1: i32, %arg2: memref<1x8x32xf32, #tpu.memory_space<vmem>>, %arg3: memref<1x1x8xf32, #tpu.memory_space<vmem>>, %arg4: memref<1x32x96xbf16, #tpu.memory_space<vmem>>, %arg5: memref<1x32x32xbf16, #tpu.memory_space<vmem>>, %arg6: memref<1x32x64xbf16, #tpu.memory_space<vmem>>, %arg7: memref<1x64x32xbf16, #tpu.memory_space<vmem>>, %arg8: memref<1x8x128xf32, #tpu.memory_space<vmem>>, %arg9: memref<32x128xbf16, #tpu.memory_space<vmem>>, %arg10: memref<1x128xf32, #tpu.memory_space<vmem>>, %arg11: memref<1x8x128xf32, #tpu.memory_space<vmem>>, %arg12: memref<8x32xf32, #tpu.memory_space<vmem>>, %arg13: memref<8x32xf32, #tpu.memory_space<vmem>>) attributes {dimension_semantics = [#tpu.dimension_semantics<parallel>, #tpu.dimension_semantics<arbitrary>], iteration_bounds = array<i64: 2, 2>, scalar_prefetch = 0 : i64, scratch_operands = 2 : i64, tpu.core_type = #tpu.core_type<tc>, window_params = [{transform_indices = @transform_0, window_bounds = array<i64: 1, 8, 32>}, {transform_indices = @transform_1, window_bounds = array<i64: 1, 1, 8>}, {transform_indices = @transform_2, window_bounds = array<i64: 1, 32, 96>}, {transform_indices = @transform_3, window_bounds = array<i64: 1, 32, 32>}, {transform_indices = @transform_4, window_bounds = array<i64: 1, 32, 64>}, {transform_indices = @transform_5, window_bounds = array<i64: 1, 64, 32>}, {transform_indices = @transform_6, window_bounds = array<i64: 1, 8, 128>}, {pipeline_mode = #tpu.pipeline_mode<synchronous>, transform_indices = @transform_7, window_bounds = array<i64: 32, 128>}, {pipeline_mode = #tpu.pipeline_mode<synchronous>, transform_indices = @transform_8, window_bounds = array<i64: 1, 128>}, {transform_indices = @transform_9, window_bounds = array<i64: 1, 8, 128>}]} {
    %c0_i32 = arith.constant 0 : i32
    %0 = arith.cmpi eq, %arg1, %c0_i32 : i32
    %1 = arith.extui %0 : i1 to i32
    %c0_i32_0 = arith.constant 0 : i32
    %2 = arith.cmpi ne, %1, %c0_i32_0 : i32
    scf.if %2 {
      %c0_81 = arith.constant 0 : index
      %c0_82 = arith.constant 0 : index
      %c0_83 = arith.constant 0 : index
      %253 = vector.load %arg2[%c0_81, %c0_82, %c0_83] : memref<1x8x32xf32, #tpu.memory_space<vmem>>, vector<1x8x32xf32>
      %254 = vector.shape_cast %253 : vector<1x8x32xf32> to vector<8x32xf32>
      %c0_84 = arith.constant 0 : index
      %c0_85 = arith.constant 0 : index
      %255 = vector.load %arg12[%c0_84, %c0_85] : memref<8x32xf32, #tpu.memory_space<vmem>>, vector<8x32xf32>
      tpu.vector_store %arg12[%c0_84, %c0_85], %254 {strides = array<i32>} : memref<8x32xf32, #tpu.memory_space<vmem>>, vector<8x32xf32>,
    } else {
    }
    %c0 = arith.constant 0 : index
    %c0_1 = arith.constant 0 : index
    %3 = vector.load %arg12[%c0, %c0_1] : memref<8x32xf32, #tpu.memory_space<vmem>>, vector<8x32xf32>
    %c0_2 = arith.constant 0 : index
    %c0_3 = arith.constant 0 : index
    %c0_4 = arith.constant 0 : index
    %4 = vector.load %arg8[%c0_2, %c0_3, %c0_4] : memref<1x8x128xf32, #tpu.memory_space<vmem>>, vector<1x8x128xf32>
    %5 = vector.shape_cast %4 : vector<1x8x128xf32> to vector<8x128xf32>
    %6 = vector.extract_strided_slice %5 {offsets = [0, 0], sizes = [1, 96], strides = [1, 1]} : vector<8x128xf32> to vector<1x96xf32>
    %7 = vector.extract_strided_slice %5 {offsets = [1, 0], sizes = [1, 32], strides = [1, 1]} : vector<8x128xf32> to vector<1x32xf32>
    %8 = vector.extract_strided_slice %5 {offsets = [2, 0], sizes = [1, 64], strides = [1, 1]} : vector<8x128xf32> to vector<1x64xf32>
    %9 = vector.extract_strided_slice %5 {offsets = [3, 0], sizes = [1, 32], strides = [1, 1]} : vector<8x128xf32> to vector<1x32xf32>
    %10 = vector.extract_strided_slice %5 {offsets = [4, 0], sizes = [1, 32], strides = [1, 1]} : vector<8x128xf32> to vector<1x32xf32>
    %11 = vector.extract_strided_slice %5 {offsets = [5, 0], sizes = [1, 32], strides = [1, 1]} : vector<8x128xf32> to vector<1x32xf32>
    %12 = vector.extract_strided_slice %5 {offsets = [6, 0], sizes = [1, 32], strides = [1, 1]} : vector<8x128xf32> to vector<1x32xf32>
    %13 = vector.extract_strided_slice %5 {offsets = [7, 0], sizes = [1, 32], strides = [1, 1]} : vector<8x128xf32> to vector<1x32xf32>
    %14 = arith.truncf %3 : vector<8x32xf32> to vector<8x32xbf16>
    %c0_5 = arith.constant 0 : index
    %c0_6 = arith.constant 0 : index
    %c0_7 = arith.constant 0 : index
    %15 = vector.load %arg4[%c0_5, %c0_6, %c0_7] : memref<1x32x96xbf16, #tpu.memory_space<vmem>>, vector<1x32x96xbf16>
    %16 = vector.shape_cast %15 : vector<1x32x96xbf16> to vector<32x96xbf16>
    %cst = arith.constant dense<0.000000e+00> : vector<8x96xf32>
    %17 = tpu.matmul %14, %16, %cst {dimension_numbers = #tpu.dot_dimension_numbers<[1], [0], [0], [1], [0, 0, 1, 1], [], []>} : vector<8x32xbf16>, vector<32x96xbf16>, vector<8x96xf32> -> vector<8x96xf32>
    %18 = vector.broadcast %6 : vector<1x96xf32> to vector<8x96xf32>
    %19 = arith.addf %17, %18 : vector<8x96xf32>
    %20 = vector.extract_strided_slice %19 {offsets = [0, 0], sizes = [8, 32], strides = [1, 1]} : vector<8x96xf32> to vector<8x32xf32>
    %cst_8 = arith.constant 5.000000e-01 : f32
    %21 = vector.broadcast %cst_8 : f32 to vector<8x32xf32>
    %22 = arith.mulf %20, %21 : vector<8x32xf32>
    %23 = arith.truncf %22 : vector<8x32xf32> to vector<8x32xbf16>
    %24 = vector.extract_strided_slice %19 {offsets = [0, 32], sizes = [8, 32], strides = [1, 1]} : vector<8x96xf32> to vector<8x32xf32>
    %25 = arith.truncf %24 : vector<8x32xf32> to vector<8x32xbf16>
    %26 = vector.extract_strided_slice %19 {offsets = [0, 64], sizes = [8, 32], strides = [1, 1]} : vector<8x96xf32> to vector<8x32xf32>
    %27 = arith.truncf %26 : vector<8x32xf32> to vector<8x32xbf16>
    %c0_9 = arith.constant 0 : index
    %c0_10 = arith.constant 0 : index
    %c0_11 = arith.constant 0 : index
    %28 = vector.load %arg3[%c0_9, %c0_10, %c0_11] : memref<1x1x8xf32, #tpu.memory_space<vmem>>, vector<1x1x8xf32>
    %29 = vector.shape_cast %28 : vector<1x1x8xf32> to vector<1x8xf32>
    %30 = vector.extract_strided_slice %23 {offsets = [0, 0], sizes = [8, 4], strides = [1, 1]} : vector<8x32xbf16> to vector<8x4xbf16>
    %31 = vector.extract_strided_slice %25 {offsets = [0, 0], sizes = [8, 4], strides = [1, 1]} : vector<8x32xbf16> to vector<8x4xbf16>
    %cst_12 = arith.constant dense<0.000000e+00> : vector<8x8xf32>
    %32 = tpu.matmul %30, %31, %cst_12 {dimension_numbers = #tpu.dot_dimension_numbers<[1], [1], [0], [0], [0, 0, 1, 0], [], []>} : vector<8x4xbf16>, vector<8x4xbf16>, vector<8x8xf32> -> vector<8x8xf32>
    %33 = vector.broadcast %29 : vector<1x8xf32> to vector<8x8xf32>
    %34 = arith.addf %32, %33 : vector<8x8xf32>
    %cst_13 = arith.constant dense<0xFF800000> : vector<8xf32>
    %35 = vector.multi_reduction <maximumf>, %34, %cst_13 [1] : vector<8x8xf32> to vector<8xf32>
    %36 = vector.shape_cast %35 : vector<8xf32> to vector<8x1xf32>
    %37 = vector.broadcast %36 : vector<8x1xf32> to vector<8x8xf32>
    %38 = arith.subf %34, %37 : vector<8x8xf32>
    %39 = math.exp %38 : vector<8x8xf32>
    %cst_14 = arith.constant dense<0.000000e+00> : vector<8xf32>
    %40 = vector.multi_reduction <add>, %39, %cst_14 [1] : vector<8x8xf32> to vector<8xf32>
    %41 = vector.shape_cast %40 : vector<8xf32> to vector<8x1xf32>
    %42 = tpu.reciprocal %41 {approx = true} : vector<8x1xf32> -> vector<8x1xf32>
    %43 = vector.broadcast %42 : vector<8x1xf32> to vector<8x8xf32>
    %44 = arith.mulf %39, %43 : vector<8x8xf32>
    %45 = arith.truncf %44 : vector<8x8xf32> to vector<8x8xbf16>
    %46 = vector.extract_strided_slice %27 {offsets = [0, 0], sizes = [8, 4], strides = [1, 1]} : vector<8x32xbf16> to vector<8x4xbf16>
    %cst_15 = arith.constant dense<0.000000e+00> : vector<8x4xf32>
    %47 = tpu.matmul %45, %46, %cst_15 {dimension_numbers = #tpu.dot_dimension_numbers<[1], [0], [0], [1], [0, 0, 1, 1], [], []>} : vector<8x8xbf16>, vector<8x4xbf16>, vector<8x4xf32> -> vector<8x4xf32>
    %c0_16 = arith.constant 0 : index
    %c0_17 = arith.constant 0 : index
    %48 = vector.load %arg13[%c0_16, %c0_17] : memref<8x32xf32, #tpu.memory_space<vmem>>, vector<8x4xf32>
    tpu.vector_store %arg13[%c0_16, %c0_17], %47 {strides = array<i32>} : memref<8x32xf32, #tpu.memory_space<vmem>>, vector<8x4xf32>,
    %49 = vector.extract_strided_slice %23 {offsets = [0, 4], sizes = [8, 4], strides = [1, 1]} : vector<8x32xbf16> to vector<8x4xbf16>
    %50 = vector.extract_strided_slice %25 {offsets = [0, 4], sizes = [8, 4], strides = [1, 1]} : vector<8x32xbf16> to vector<8x4xbf16>
    %cst_18 = arith.constant dense<0.000000e+00> : vector<8x8xf32>
    %51 = tpu.matmul %49, %50, %cst_18 {dimension_numbers = #tpu.dot_dimension_numbers<[1], [1], [0], [0], [0, 0, 1, 0], [], []>} : vector<8x4xbf16>, vector<8x4xbf16>, vector<8x8xf32> -> vector<8x8xf32>
    %52 = vector.broadcast %29 : vector<1x8xf32> to vector<8x8xf32>
    %53 = arith.addf %51, %52 : vector<8x8xf32>
    %cst_19 = arith.constant dense<0xFF800000> : vector<8xf32>
    %54 = vector.multi_reduction <maximumf>, %53, %cst_19 [1] : vector<8x8xf32> to vector<8xf32>
    %55 = vector.shape_cast %54 : vector<8xf32> to vector<8x1xf32>
    %56 = vector.broadcast %55 : vector<8x1xf32> to vector<8x8xf32>
    %57 = arith.subf %53, %56 : vector<8x8xf32>
    %58 = math.exp %57 : vector<8x8xf32>
    %cst_20 = arith.constant dense<0.000000e+00> : vector<8xf32>
    %59 = vector.multi_reduction <add>, %58, %cst_20 [1] : vector<8x8xf32> to vector<8xf32>
    %60 = vector.shape_cast %59 : vector<8xf32> to vector<8x1xf32>
    %61 = tpu.reciprocal %60 {approx = true} : vector<8x1xf32> -> vector<8x1xf32>
    %62 = vector.broadcast %61 : vector<8x1xf32> to vector<8x8xf32>
    %63 = arith.mulf %58, %62 : vector<8x8xf32>
    %64 = arith.truncf %63 : vector<8x8xf32> to vector<8x8xbf16>
    %65 = vector.extract_strided_slice %27 {offsets = [0, 4], sizes = [8, 4], strides = [1, 1]} : vector<8x32xbf16> to vector<8x4xbf16>
    %cst_21 = arith.constant dense<0.000000e+00> : vector<8x4xf32>
    %66 = tpu.matmul %64, %65, %cst_21 {dimension_numbers = #tpu.dot_dimension_numbers<[1], [0], [0], [1], [0, 0, 1, 1], [], []>} : vector<8x8xbf16>, vector<8x4xbf16>, vector<8x4xf32> -> vector<8x4xf32>
    %c0_22 = arith.constant 0 : index
    %c4 = arith.constant 4 : index
    %67 = vector.load %arg13[%c0_22, %c4] : memref<8x32xf32, #tpu.memory_space<vmem>>, vector<8x4xf32>
    tpu.vector_store %arg13[%c0_22, %c4], %66 {strides = array<i32>} : memref<8x32xf32, #tpu.memory_space<vmem>>, vector<8x4xf32>,
    %68 = vector.extract_strided_slice %23 {offsets = [0, 8], sizes = [8, 4], strides = [1, 1]} : vector<8x32xbf16> to vector<8x4xbf16>
    %69 = vector.extract_strided_slice %25 {offsets = [0, 8], sizes = [8, 4], strides = [1, 1]} : vector<8x32xbf16> to vector<8x4xbf16>
    %cst_23 = arith.constant dense<0.000000e+00> : vector<8x8xf32>
    %70 = tpu.matmul %68, %69, %cst_23 {dimension_numbers = #tpu.dot_dimension_numbers<[1], [1], [0], [0], [0, 0, 1, 0], [], []>} : vector<8x4xbf16>, vector<8x4xbf16>, vector<8x8xf32> -> vector<8x8xf32>
    %71 = vector.broadcast %29 : vector<1x8xf32> to vector<8x8xf32>
    %72 = arith.addf %70, %71 : vector<8x8xf32>
    %cst_24 = arith.constant dense<0xFF800000> : vector<8xf32>
    %73 = vector.multi_reduction <maximumf>, %72, %cst_24 [1] : vector<8x8xf32> to vector<8xf32>
    %74 = vector.shape_cast %73 : vector<8xf32> to vector<8x1xf32>
    %75 = vector.broadcast %74 : vector<8x1xf32> to vector<8x8xf32>
    %76 = arith.subf %72, %75 : vector<8x8xf32>
    %77 = math.exp %76 : vector<8x8xf32>
    %cst_25 = arith.constant dense<0.000000e+00> : vector<8xf32>
    %78 = vector.multi_reduction <add>, %77, %cst_25 [1] : vector<8x8xf32> to vector<8xf32>
    %79 = vector.shape_cast %78 : vector<8xf32> to vector<8x1xf32>
    %80 = tpu.reciprocal %79 {approx = true} : vector<8x1xf32> -> vector<8x1xf32>
    %81 = vector.broadcast %80 : vector<8x1xf32> to vector<8x8xf32>
    %82 = arith.mulf %77, %81 : vector<8x8xf32>
    %83 = arith.truncf %82 : vector<8x8xf32> to vector<8x8xbf16>
    %84 = vector.extract_strided_slice %27 {offsets = [0, 8], sizes = [8, 4], strides = [1, 1]} : vector<8x32xbf16> to vector<8x4xbf16>
    %cst_26 = arith.constant dense<0.000000e+00> : vector<8x4xf32>
    %85 = tpu.matmul %83, %84, %cst_26 {dimension_numbers = #tpu.dot_dimension_numbers<[1], [0], [0], [1], [0, 0, 1, 1], [], []>} : vector<8x8xbf16>, vector<8x4xbf16>, vector<8x4xf32> -> vector<8x4xf32>
    %c0_27 = arith.constant 0 : index
    %c8 = arith.constant 8 : index
    %86 = vector.load %arg13[%c0_27, %c8] : memref<8x32xf32, #tpu.memory_space<vmem>>, vector<8x4xf32>
    tpu.vector_store %arg13[%c0_27, %c8], %85 {strides = array<i32>} : memref<8x32xf32, #tpu.memory_space<vmem>>, vector<8x4xf32>,
    %87 = vector.extract_strided_slice %23 {offsets = [0, 12], sizes = [8, 4], strides = [1, 1]} : vector<8x32xbf16> to vector<8x4xbf16>
    %88 = vector.extract_strided_slice %25 {offsets = [0, 12], sizes = [8, 4], strides = [1, 1]} : vector<8x32xbf16> to vector<8x4xbf16>
    %cst_28 = arith.constant dense<0.000000e+00> : vector<8x8xf32>
    %89 = tpu.matmul %87, %88, %cst_28 {dimension_numbers = #tpu.dot_dimension_numbers<[1], [1], [0], [0], [0, 0, 1, 0], [], []>} : vector<8x4xbf16>, vector<8x4xbf16>, vector<8x8xf32> -> vector<8x8xf32>
    %90 = vector.broadcast %29 : vector<1x8xf32> to vector<8x8xf32>
    %91 = arith.addf %89, %90 : vector<8x8xf32>
    %cst_29 = arith.constant dense<0xFF800000> : vector<8xf32>
    %92 = vector.multi_reduction <maximumf>, %91, %cst_29 [1] : vector<8x8xf32> to vector<8xf32>
    %93 = vector.shape_cast %92 : vector<8xf32> to vector<8x1xf32>
    %94 = vector.broadcast %93 : vector<8x1xf32> to vector<8x8xf32>
    %95 = arith.subf %91, %94 : vector<8x8xf32>
    %96 = math.exp %95 : vector<8x8xf32>
    %cst_30 = arith.constant dense<0.000000e+00> : vector<8xf32>
    %97 = vector.multi_reduction <add>, %96, %cst_30 [1] : vector<8x8xf32> to vector<8xf32>
    %98 = vector.shape_cast %97 : vector<8xf32> to vector<8x1xf32>
    %99 = tpu.reciprocal %98 {approx = true} : vector<8x1xf32> -> vector<8x1xf32>
    %100 = vector.broadcast %99 : vector<8x1xf32> to vector<8x8xf32>
    %101 = arith.mulf %96, %100 : vector<8x8xf32>
    %102 = arith.truncf %101 : vector<8x8xf32> to vector<8x8xbf16>
    %103 = vector.extract_strided_slice %27 {offsets = [0, 12], sizes = [8, 4], strides = [1, 1]} : vector<8x32xbf16> to vector<8x4xbf16>
    %cst_31 = arith.constant dense<0.000000e+00> : vector<8x4xf32>
    %104 = tpu.matmul %102, %103, %cst_31 {dimension_numbers = #tpu.dot_dimension_numbers<[1], [0], [0], [1], [0, 0, 1, 1], [], []>} : vector<8x8xbf16>, vector<8x4xbf16>, vector<8x4xf32> -> vector<8x4xf32>
    %c0_32 = arith.constant 0 : index
    %c12 = arith.constant 12 : index
    %105 = vector.load %arg13[%c0_32, %c12] : memref<8x32xf32, #tpu.memory_space<vmem>>, vector<8x4xf32>
    tpu.vector_store %arg13[%c0_32, %c12], %104 {strides = array<i32>} : memref<8x32xf32, #tpu.memory_space<vmem>>, vector<8x4xf32>,
    %106 = vector.extract_strided_slice %23 {offsets = [0, 16], sizes = [8, 4], strides = [1, 1]} : vector<8x32xbf16> to vector<8x4xbf16>
    %107 = vector.extract_strided_slice %25 {offsets = [0, 16], sizes = [8, 4], strides = [1, 1]} : vector<8x32xbf16> to vector<8x4xbf16>
    %cst_33 = arith.constant dense<0.000000e+00> : vector<8x8xf32>
    %108 = tpu.matmul %106, %107, %cst_33 {dimension_numbers = #tpu.dot_dimension_numbers<[1], [1], [0], [0], [0, 0, 1, 0], [], []>} : vector<8x4xbf16>, vector<8x4xbf16>, vector<8x8xf32> -> vector<8x8xf32>
    %109 = vector.broadcast %29 : vector<1x8xf32> to vector<8x8xf32>
    %110 = arith.addf %108, %109 : vector<8x8xf32>
    %cst_34 = arith.constant dense<0xFF800000> : vector<8xf32>
    %111 = vector.multi_reduction <maximumf>, %110, %cst_34 [1] : vector<8x8xf32> to vector<8xf32>
    %112 = vector.shape_cast %111 : vector<8xf32> to vector<8x1xf32>
    %113 = vector.broadcast %112 : vector<8x1xf32> to vector<8x8xf32>
    %114 = arith.subf %110, %113 : vector<8x8xf32>
    %115 = math.exp %114 : vector<8x8xf32>
    %cst_35 = arith.constant dense<0.000000e+00> : vector<8xf32>
    %116 = vector.multi_reduction <add>, %115, %cst_35 [1] : vector<8x8xf32> to vector<8xf32>
    %117 = vector.shape_cast %116 : vector<8xf32> to vector<8x1xf32>
    %118 = tpu.reciprocal %117 {approx = true} : vector<8x1xf32> -> vector<8x1xf32>
    %119 = vector.broadcast %118 : vector<8x1xf32> to vector<8x8xf32>
    %120 = arith.mulf %115, %119 : vector<8x8xf32>
    %121 = arith.truncf %120 : vector<8x8xf32> to vector<8x8xbf16>
    %122 = vector.extract_strided_slice %27 {offsets = [0, 16], sizes = [8, 4], strides = [1, 1]} : vector<8x32xbf16> to vector<8x4xbf16>
    %cst_36 = arith.constant dense<0.000000e+00> : vector<8x4xf32>
    %123 = tpu.matmul %121, %122, %cst_36 {dimension_numbers = #tpu.dot_dimension_numbers<[1], [0], [0], [1], [0, 0, 1, 1], [], []>} : vector<8x8xbf16>, vector<8x4xbf16>, vector<8x4xf32> -> vector<8x4xf32>
    %c0_37 = arith.constant 0 : index
    %c16 = arith.constant 16 : index
    %124 = vector.load %arg13[%c0_37, %c16] : memref<8x32xf32, #tpu.memory_space<vmem>>, vector<8x4xf32>
    tpu.vector_store %arg13[%c0_37, %c16], %123 {strides = array<i32>} : memref<8x32xf32, #tpu.memory_space<vmem>>, vector<8x4xf32>,
    %125 = vector.extract_strided_slice %23 {offsets = [0, 20], sizes = [8, 4], strides = [1, 1]} : vector<8x32xbf16> to vector<8x4xbf16>
    %126 = vector.extract_strided_slice %25 {offsets = [0, 20], sizes = [8, 4], strides = [1, 1]} : vector<8x32xbf16> to vector<8x4xbf16>
    %cst_38 = arith.constant dense<0.000000e+00> : vector<8x8xf32>
    %127 = tpu.matmul %125, %126, %cst_38 {dimension_numbers = #tpu.dot_dimension_numbers<[1], [1], [0], [0], [0, 0, 1, 0], [], []>} : vector<8x4xbf16>, vector<8x4xbf16>, vector<8x8xf32> -> vector<8x8xf32>
    %128 = vector.broadcast %29 : vector<1x8xf32> to vector<8x8xf32>
    %129 = arith.addf %127, %128 : vector<8x8xf32>
    %cst_39 = arith.constant dense<0xFF800000> : vector<8xf32>
    %130 = vector.multi_reduction <maximumf>, %129, %cst_39 [1] : vector<8x8xf32> to vector<8xf32>
    %131 = vector.shape_cast %130 : vector<8xf32> to vector<8x1xf32>
    %132 = vector.broadcast %131 : vector<8x1xf32> to vector<8x8xf32>
    %133 = arith.subf %129, %132 : vector<8x8xf32>
    %134 = math.exp %133 : vector<8x8xf32>
    %cst_40 = arith.constant dense<0.000000e+00> : vector<8xf32>
    %135 = vector.multi_reduction <add>, %134, %cst_40 [1] : vector<8x8xf32> to vector<8xf32>
    %136 = vector.shape_cast %135 : vector<8xf32> to vector<8x1xf32>
    %137 = tpu.reciprocal %136 {approx = true} : vector<8x1xf32> -> vector<8x1xf32>
    %138 = vector.broadcast %137 : vector<8x1xf32> to vector<8x8xf32>
    %139 = arith.mulf %134, %138 : vector<8x8xf32>
    %140 = arith.truncf %139 : vector<8x8xf32> to vector<8x8xbf16>
    %141 = vector.extract_strided_slice %27 {offsets = [0, 20], sizes = [8, 4], strides = [1, 1]} : vector<8x32xbf16> to vector<8x4xbf16>
    %cst_41 = arith.constant dense<0.000000e+00> : vector<8x4xf32>
    %142 = tpu.matmul %140, %141, %cst_41 {dimension_numbers = #tpu.dot_dimension_numbers<[1], [0], [0], [1], [0, 0, 1, 1], [], []>} : vector<8x8xbf16>, vector<8x4xbf16>, vector<8x4xf32> -> vector<8x4xf32>
    %c0_42 = arith.constant 0 : index
    %c20 = arith.constant 20 : index
    %143 = vector.load %arg13[%c0_42, %c20] : memref<8x32xf32, #tpu.memory_space<vmem>>, vector<8x4xf32>
    tpu.vector_store %arg13[%c0_42, %c20], %142 {strides = array<i32>} : memref<8x32xf32, #tpu.memory_space<vmem>>, vector<8x4xf32>,
    %144 = vector.extract_strided_slice %23 {offsets = [0, 24], sizes = [8, 4], strides = [1, 1]} : vector<8x32xbf16> to vector<8x4xbf16>
    %145 = vector.extract_strided_slice %25 {offsets = [0, 24], sizes = [8, 4], strides = [1, 1]} : vector<8x32xbf16> to vector<8x4xbf16>
    %cst_43 = arith.constant dense<0.000000e+00> : vector<8x8xf32>
    %146 = tpu.matmul %144, %145, %cst_43 {dimension_numbers = #tpu.dot_dimension_numbers<[1], [1], [0], [0], [0, 0, 1, 0], [], []>} : vector<8x4xbf16>, vector<8x4xbf16>, vector<8x8xf32> -> vector<8x8xf32>
    %147 = vector.broadcast %29 : vector<1x8xf32> to vector<8x8xf32>
    %148 = arith.addf %146, %147 : vector<8x8xf32>
    %cst_44 = arith.constant dense<0xFF800000> : vector<8xf32>
    %149 = vector.multi_reduction <maximumf>, %148, %cst_44 [1] : vector<8x8xf32> to vector<8xf32>
    %150 = vector.shape_cast %149 : vector<8xf32> to vector<8x1xf32>
    %151 = vector.broadcast %150 : vector<8x1xf32> to vector<8x8xf32>
    %152 = arith.subf %148, %151 : vector<8x8xf32>
    %153 = math.exp %152 : vector<8x8xf32>
    %cst_45 = arith.constant dense<0.000000e+00> : vector<8xf32>
    %154 = vector.multi_reduction <add>, %153, %cst_45 [1] : vector<8x8xf32> to vector<8xf32>
    %155 = vector.shape_cast %154 : vector<8xf32> to vector<8x1xf32>
    %156 = tpu.reciprocal %155 {approx = true} : vector<8x1xf32> -> vector<8x1xf32>
    %157 = vector.broadcast %156 : vector<8x1xf32> to vector<8x8xf32>
    %158 = arith.mulf %153, %157 : vector<8x8xf32>
    %159 = arith.truncf %158 : vector<8x8xf32> to vector<8x8xbf16>
    %160 = vector.extract_strided_slice %27 {offsets = [0, 24], sizes = [8, 4], strides = [1, 1]} : vector<8x32xbf16> to vector<8x4xbf16>
    %cst_46 = arith.constant dense<0.000000e+00> : vector<8x4xf32>
    %161 = tpu.matmul %159, %160, %cst_46 {dimension_numbers = #tpu.dot_dimension_numbers<[1], [0], [0], [1], [0, 0, 1, 1], [], []>} : vector<8x8xbf16>, vector<8x4xbf16>, vector<8x4xf32> -> vector<8x4xf32>
    %c0_47 = arith.constant 0 : index
    %c24 = arith.constant 24 : index
    %162 = vector.load %arg13[%c0_47, %c24] : memref<8x32xf32, #tpu.memory_space<vmem>>, vector<8x4xf32>
    tpu.vector_store %arg13[%c0_47, %c24], %161 {strides = array<i32>} : memref<8x32xf32, #tpu.memory_space<vmem>>, vector<8x4xf32>,
    %163 = vector.extract_strided_slice %23 {offsets = [0, 28], sizes = [8, 4], strides = [1, 1]} : vector<8x32xbf16> to vector<8x4xbf16>
    %164 = vector.extract_strided_slice %25 {offsets = [0, 28], sizes = [8, 4], strides = [1, 1]} : vector<8x32xbf16> to vector<8x4xbf16>
    %cst_48 = arith.constant dense<0.000000e+00> : vector<8x8xf32>
    %165 = tpu.matmul %163, %164, %cst_48 {dimension_numbers = #tpu.dot_dimension_numbers<[1], [1], [0], [0], [0, 0, 1, 0], [], []>} : vector<8x4xbf16>, vector<8x4xbf16>, vector<8x8xf32> -> vector<8x8xf32>
    %166 = vector.broadcast %29 : vector<1x8xf32> to vector<8x8xf32>
    %167 = arith.addf %165, %166 : vector<8x8xf32>
    %cst_49 = arith.constant dense<0xFF800000> : vector<8xf32>
    %168 = vector.multi_reduction <maximumf>, %167, %cst_49 [1] : vector<8x8xf32> to vector<8xf32>
    %169 = vector.shape_cast %168 : vector<8xf32> to vector<8x1xf32>
    %170 = vector.broadcast %169 : vector<8x1xf32> to vector<8x8xf32>
    %171 = arith.subf %167, %170 : vector<8x8xf32>
    %172 = math.exp %171 : vector<8x8xf32>
    %cst_50 = arith.constant dense<0.000000e+00> : vector<8xf32>
    %173 = vector.multi_reduction <add>, %172, %cst_50 [1] : vector<8x8xf32> to vector<8xf32>
    %174 = vector.shape_cast %173 : vector<8xf32> to vector<8x1xf32>
    %175 = tpu.reciprocal %174 {approx = true} : vector<8x1xf32> -> vector<8x1xf32>
    %176 = vector.broadcast %175 : vector<8x1xf32> to vector<8x8xf32>
    %177 = arith.mulf %172, %176 : vector<8x8xf32>
    %178 = arith.truncf %177 : vector<8x8xf32> to vector<8x8xbf16>
    %179 = vector.extract_strided_slice %27 {offsets = [0, 28], sizes = [8, 4], strides = [1, 1]} : vector<8x32xbf16> to vector<8x4xbf16>
    %cst_51 = arith.constant dense<0.000000e+00> : vector<8x4xf32>
    %180 = tpu.matmul %178, %179, %cst_51 {dimension_numbers = #tpu.dot_dimension_numbers<[1], [0], [0], [1], [0, 0, 1, 1], [], []>} : vector<8x8xbf16>, vector<8x4xbf16>, vector<8x4xf32> -> vector<8x4xf32>
    %c0_52 = arith.constant 0 : index
    %c28 = arith.constant 28 : index
    %181 = vector.load %arg13[%c0_52, %c28] : memref<8x32xf32, #tpu.memory_space<vmem>>, vector<8x4xf32>
    tpu.vector_store %arg13[%c0_52, %c28], %180 {strides = array<i32>} : memref<8x32xf32, #tpu.memory_space<vmem>>, vector<8x4xf32>,
    %c0_53 = arith.constant 0 : index
    %c0_54 = arith.constant 0 : index
    %182 = vector.load %arg13[%c0_53, %c0_54] : memref<8x32xf32, #tpu.memory_space<vmem>>, vector<8x32xf32>
    %183 = arith.truncf %182 : vector<8x32xf32> to vector<8x32xbf16>
    %c0_55 = arith.constant 0 : index
    %c0_56 = arith.constant 0 : index
    %c0_57 = arith.constant 0 : index
    %184 = vector.load %arg5[%c0_55, %c0_56, %c0_57] : memref<1x32x32xbf16, #tpu.memory_space<vmem>>, vector<1x32x32xbf16>
    %185 = vector.shape_cast %184 : vector<1x32x32xbf16> to vector<32x32xbf16>
    %cst_58 = arith.constant dense<0.000000e+00> : vector<8x32xf32>
    %186 = tpu.matmul %183, %185, %cst_58 {dimension_numbers = #tpu.dot_dimension_numbers<[1], [0], [0], [1], [0, 0, 1, 1], [], []>} : vector<8x32xbf16>, vector<32x32xbf16>, vector<8x32xf32> -> vector<8x32xf32>
    %187 = vector.broadcast %7 : vector<1x32xf32> to vector<8x32xf32>
    %188 = arith.addf %186, %187 : vector<8x32xf32>
    %189 = arith.addf %3, %188 : vector<8x32xf32>
    %cst_59 = arith.constant dense<0.000000e+00> : vector<8xf32>
    %190 = vector.multi_reduction <add>, %189, %cst_59 [1] : vector<8x32xf32> to vector<8xf32>
    %191 = vector.shape_cast %190 : vector<8xf32> to vector<8x1xf32>
    %cst_60 = arith.constant 3.200000e+01 : f32
    %192 = vector.broadcast %cst_60 : f32 to vector<8x1xf32>
    %193 = arith.divf %191, %192 : vector<8x1xf32>
    %194 = vector.broadcast %193 : vector<8x1xf32> to vector<8x32xf32>
    %195 = arith.subf %189, %194 : vector<8x32xf32>
    %196 = arith.mulf %195, %195 : vector<8x32xf32>
    %cst_61 = arith.constant dense<0.000000e+00> : vector<8xf32>
    %197 = vector.multi_reduction <add>, %196, %cst_61 [1] : vector<8x32xf32> to vector<8xf32>
    %198 = vector.shape_cast %197 : vector<8xf32> to vector<8x1xf32>
    %cst_62 = arith.constant 3.200000e+01 : f32
    %199 = vector.broadcast %cst_62 : f32 to vector<8x1xf32>
    %200 = arith.divf %198, %199 : vector<8x1xf32>
    %201 = vector.broadcast %193 : vector<8x1xf32> to vector<8x32xf32>
    %202 = arith.subf %189, %201 : vector<8x32xf32>
    %cst_63 = arith.constant 9.99999974E-6 : f32
    %203 = vector.broadcast %cst_63 : f32 to vector<8x1xf32>
    %204 = arith.addf %200, %203 : vector<8x1xf32>
    %205 = math.rsqrt %204 : vector<8x1xf32>
    %206 = vector.broadcast %205 : vector<8x1xf32> to vector<8x32xf32>
    %207 = arith.mulf %202, %206 : vector<8x32xf32>
    %208 = vector.broadcast %10 : vector<1x32xf32> to vector<8x32xf32>
    %209 = arith.mulf %207, %208 : vector<8x32xf32>
    %210 = vector.broadcast %11 : vector<1x32xf32> to vector<8x32xf32>
    %211 = arith.addf %209, %210 : vector<8x32xf32>
    %212 = arith.truncf %211 : vector<8x32xf32> to vector<8x32xbf16>
    %c0_64 = arith.constant 0 : index
    %c0_65 = arith.constant 0 : index
    %c0_66 = arith.constant 0 : index
    %213 = vector.load %arg6[%c0_64, %c0_65, %c0_66] : memref<1x32x64xbf16, #tpu.memory_space<vmem>>, vector<1x32x64xbf16>
    %214 = vector.shape_cast %213 : vector<1x32x64xbf16> to vector<32x64xbf16>
    %cst_67 = arith.constant dense<0.000000e+00> : vector<8x64xf32>
    %215 = tpu.matmul %212, %214, %cst_67 {dimension_numbers = #tpu.dot_dimension_numbers<[1], [0], [0], [1], [0, 0, 1, 1], [], []>} : vector<8x32xbf16>, vector<32x64xbf16>, vector<8x64xf32> -> vector<8x64xf32>
    %216 = vector.broadcast %8 : vector<1x64xf32> to vector<8x64xf32>
    %217 = arith.addf %215, %216 : vector<8x64xf32>
    %cst_68 = arith.constant 0.000000e+00 : f32
    %218 = vector.broadcast %cst_68 : f32 to vector<8x64xf32>
    %219 = arith.maximumf %217, %218 : vector<8x64xf32>
    %220 = arith.truncf %219 : vector<8x64xf32> to vector<8x64xbf16>
    %c0_69 = arith.constant 0 : index
    %c0_70 = arith.constant 0 : index
    %c0_71 = arith.constant 0 : index
    %221 = vector.load %arg7[%c0_69, %c0_70, %c0_71] : memref<1x64x32xbf16, #tpu.memory_space<vmem>>, vector<1x64x32xbf16>
    %222 = vector.shape_cast %221 : vector<1x64x32xbf16> to vector<64x32xbf16>
    %cst_72 = arith.constant dense<0.000000e+00> : vector<8x32xf32>
    %223 = tpu.matmul %220, %222, %cst_72 {dimension_numbers = #tpu.dot_dimension_numbers<[1], [0], [0], [1], [0, 0, 1, 1], [], []>} : vector<8x64xbf16>, vector<64x32xbf16>, vector<8x32xf32> -> vector<8x32xf32>
    %224 = vector.broadcast %9 : vector<1x32xf32> to vector<8x32xf32>
    %225 = arith.addf %223, %224 : vector<8x32xf32>
    %226 = arith.addf %211, %225 : vector<8x32xf32>
    %cst_73 = arith.constant dense<0.000000e+00> : vector<8xf32>
    %227 = vector.multi_reduction <add>, %226, %cst_73 [1] : vector<8x32xf32> to vector<8xf32>
    %228 = vector.shape_cast %227 : vector<8xf32> to vector<8x1xf32>
    %cst_74 = arith.constant 3.200000e+01 : f32
    %229 = vector.broadcast %cst_74 : f32 to vector<8x1xf32>
    %230 = arith.divf %228, %229 : vector<8x1xf32>
    %231 = vector.broadcast %230 : vector<8x1xf32> to vector<8x32xf32>
    %232 = arith.subf %226, %231 : vector<8x32xf32>
    %233 = arith.mulf %232, %232 : vector<8x32xf32>
    %cst_75 = arith.constant dense<0.000000e+00> : vector<8xf32>
    %234 = vector.multi_reduction <add>, %233, %cst_75 [1] : vector<8x32xf32> to vector<8xf32>
    %235 = vector.shape_cast %234 : vector<8xf32> to vector<8x1xf32>
    %cst_76 = arith.constant 3.200000e+01 : f32
    %236 = vector.broadcast %cst_76 : f32 to vector<8x1xf32>
    %237 = arith.divf %235, %236 : vector<8x1xf32>
    %238 = vector.broadcast %230 : vector<8x1xf32> to vector<8x32xf32>
    %239 = arith.subf %226, %238 : vector<8x32xf32>
    %cst_77 = arith.constant 9.99999974E-6 : f32
    %240 = vector.broadcast %cst_77 : f32 to vector<8x1xf32>
    %241 = arith.addf %237, %240 : vector<8x1xf32>
    %242 = math.rsqrt %241 : vector<8x1xf32>
    %243 = vector.broadcast %242 : vector<8x1xf32> to vector<8x32xf32>
    %244 = arith.mulf %239, %243 : vector<8x32xf32>
    %245 = vector.broadcast %12 : vector<1x32xf32> to vector<8x32xf32>
    %246 = arith.mulf %244, %245 : vector<8x32xf32>
    %247 = vector.broadcast %13 : vector<1x32xf32> to vector<8x32xf32>
    %248 = arith.addf %246, %247 : vector<8x32xf32>
    %c0_78 = arith.constant 0 : index
    %c0_79 = arith.constant 0 : index
    %249 = vector.load %arg12[%c0_78, %c0_79] : memref<8x32xf32, #tpu.memory_space<vmem>>, vector<8x32xf32>
    tpu.vector_store %arg12[%c0_78, %c0_79], %248 {strides = array<i32>} : memref<8x32xf32, #tpu.memory_space<vmem>>, vector<8x32xf32>,
    %c1_i32 = arith.constant 1 : i32
    %250 = arith.cmpi eq, %arg1, %c1_i32 : i32
    %251 = arith.extui %250 : i1 to i32
    %c0_i32_80 = arith.constant 0 : i32
    %252 = arith.cmpi ne, %251, %c0_i32_80 : i32
    scf.if %252 {
      %253 = arith.truncf %248 : vector<8x32xf32> to vector<8x32xbf16>
      %c0_81 = arith.constant 0 : index
      %c0_82 = arith.constant 0 : index
      %254 = vector.load %arg9[%c0_81, %c0_82] : memref<32x128xbf16, #tpu.memory_space<vmem>>, vector<32x128xbf16>
      %cst_83 = arith.constant dense<0.000000e+00> : vector<8x128xf32>
      %255 = tpu.matmul %253, %254, %cst_83 {dimension_numbers = #tpu.dot_dimension_numbers<[1], [0], [0], [1], [0, 0, 1, 1], [], []>} : vector<8x32xbf16>, vector<32x128xbf16>, vector<8x128xf32> -> vector<8x128xf32>
      %c0_84 = arith.constant 0 : index
      %c0_85 = arith.constant 0 : index
      %256 = vector.load %arg10[%c0_84, %c0_85] : memref<1x128xf32, #tpu.memory_space<vmem>>, vector<1x128xf32>
      %257 = vector.broadcast %256 : vector<1x128xf32> to vector<8x128xf32>
      %258 = arith.addf %255, %257 : vector<8x128xf32>
      %c0_86 = arith.constant 0 : index
      %c0_87 = arith.constant 0 : index
      %c0_88 = arith.constant 0 : index
      %259 = vector.load %arg11[%c0_86, %c0_87, %c0_88] : memref<1x8x128xf32, #tpu.memory_space<vmem>>, vector<1x8x128xf32>
      %260 = vector.shape_cast %259 : vector<1x8x128xf32> to vector<8x128xf32>
      %261 = vector.shape_cast %258 : vector<8x128xf32> to vector<1x8x128xf32>
      tpu.vector_store %arg11[%c0_86, %c0_87, %c0_88], %261 {strides = array<i32>} : memref<1x8x128xf32, #tpu.memory_space<vmem>>, vector<1x8x128xf32>,
    } else {
    }
    return
  }
  func.func @transform_0(%arg0: i32, %arg1: i32) -> (i32, i32, i32) {
    %c0_i32 = arith.constant 0 : i32
    %c0_i32_0 = arith.constant 0 : i32
    %c0_i32_1 = arith.constant 0 : i32
    return %arg0, %c0_i32, %c0_i32_0 : i32, i32, i32
  }
  func.func @transform_1(%arg0: i32, %arg1: i32) -> (i32, i32, i32) {
    %c0_i32 = arith.constant 0 : i32
    %c0_i32_0 = arith.constant 0 : i32
    %c0_i32_1 = arith.constant 0 : i32
    return %arg0, %c0_i32, %c0_i32_0 : i32, i32, i32
  }
  func.func @transform_2(%arg0: i32, %arg1: i32) -> (i32, i32, i32) {
    %c0_i32 = arith.constant 0 : i32
    %c0_i32_0 = arith.constant 0 : i32
    %c0_i32_1 = arith.constant 0 : i32
    return %arg1, %c0_i32, %c0_i32_0 : i32, i32, i32
  }
  func.func @transform_3(%arg0: i32, %arg1: i32) -> (i32, i32, i32) {
    %c0_i32 = arith.constant 0 : i32
    %c0_i32_0 = arith.constant 0 : i32
    %c0_i32_1 = arith.constant 0 : i32
    return %arg1, %c0_i32, %c0_i32_0 : i32, i32, i32
  }
  func.func @transform_4(%arg0: i32, %arg1: i32) -> (i32, i32, i32) {
    %c0_i32 = arith.constant 0 : i32
    %c0_i32_0 = arith.constant 0 : i32
    %c0_i32_1 = arith.constant 0 : i32
    return %arg1, %c0_i32, %c0_i32_0 : i32, i32, i32
  }
  func.func @transform_5(%arg0: i32, %arg1: i32) -> (i32, i32, i32) {
    %c0_i32 = arith.constant 0 : i32
    %c0_i32_0 = arith.constant 0 : i32
    %c0_i32_1 = arith.constant 0 : i32
    return %arg1, %c0_i32, %c0_i32_0 : i32, i32, i32
  }
  func.func @transform_6(%arg0: i32, %arg1: i32) -> (i32, i32, i32) {
    %c0_i32 = arith.constant 0 : i32
    %c0_i32_0 = arith.constant 0 : i32
    %c0_i32_1 = arith.constant 0 : i32
    return %arg1, %c0_i32, %c0_i32_0 : i32, i32, i32
  }
  func.func @transform_7(%arg0: i32, %arg1: i32) -> (i32, i32) {
    %c0_i32 = arith.constant 0 : i32
    %c0_i32_0 = arith.constant 0 : i32
    %c0_i32_1 = arith.constant 0 : i32
    return %c0_i32, %c0_i32_0 : i32, i32
  }
  func.func @transform_8(%arg0: i32, %arg1: i32) -> (i32, i32) {
    %c0_i32 = arith.constant 0 : i32
    %c0_i32_0 = arith.constant 0 : i32
    %c0_i32_1 = arith.constant 0 : i32
    return %c0_i32, %c0_i32_0 : i32, i32
  }
  func.func @transform_9(%arg0: i32, %arg1: i32) -> (i32, i32, i32) {
    %c0_i32 = arith.constant 0 : i32
    %c0_i32_0 = arith.constant 0 : i32
    %c0_i32_1 = arith.constant 0 : i32
    return %arg0, %c0_i32, %c0_i32_0 : i32, i32, i32
  }
}

</mosaic_0001>

<bundles_post_ra>
// kernel: tpu_custom_call.1
= control target key start
LH: loop header
LB: loop body
LE: loop exit
PB: predicated region body
PF: predicated region fallthrough
CT: control target
= control target key end

     0   :  { %s2564_s0 = inlined_call_operand.hbm [shape: f32[2,8,32], index: 0, kind: input, shape index: {}]   ;;  %s2565_s1 = inlined_call_operand.hbm [shape: f32[2,1,8], index: 1, kind: input, shape index: {}]   ;;  %s2566_s2 = inlined_call_operand.vmem [shape: bf16[2,32,96], index: 2, kind: input, shape index: {}]   ;;  %s2567_s3 = inlined_call_operand.vmem [shape: bf16[2,32,32], index: 3, kind: input, shape index: {}]   ;;  %s2568_s4 = inlined_call_operand.vmem [shape: bf16[2,32,64], index: 4, kind: input, shape index: {}]   ;;  %s2569_s5 = inlined_call_operand.vmem [shape: bf16[2,64,32], index: 5, kind: input, shape index: {}]   ;;  %s2570_s6 = inlined_call_operand.hbm [shape: f32[2,8,128], index: 6, kind: input, shape index: {}]   ;;  %s2571_s7 = inlined_call_operand.hbm [shape: bf16[32,128], index: 7, kind: input, shape index: {}]   ;;  %s2572_s8 = inlined_call_operand.vmem [shape: f32[1,128], index: 8, kind: input, shape index: {}]   ;;  %s2573_s9 = inlined_call_operand.hbm [shape: f32[2,8,128], index: 9, kind: output, shape index: {}]  }
   0x1   :  { %2583 = sst [smem:[#allocation26_spill]] %s2564_s0 }
   0x2   :  { %2584 = sst [smem:[#allocation27_spill]] %s2565_s1 }
   0x3   :  { %2585 = sst [smem:[#allocation28_spill]] %s2567_s3 }
   0x4   :  { %2586 = sst [smem:[#allocation29_spill]] %s2568_s4 }
   0x5   :  { %2587 = sst [smem:[#allocation30_spill]] %s2569_s5 }
   0x6   :  { %2588 = sst [smem:[#allocation31_spill]] %s2570_s6 }
   0x7   :  { %2589 = sst [smem:[#allocation32_spill]] %s2571_s7 }
   0x8   :  { %2590 = sst [smem:[#allocation33_spill]] %s2572_s8 }
   0x9   :  { %2591 = sst [smem:[#allocation34_spill]] %s2573_s9 }
   0xa   :  { %14 = vsyncpa [#allocation5], 0 }
   0xb   :  { %16 = vsyncpa [#allocation5 + $0x1], 0 }
   0xc   :  { %17 = vsyncpa [#allocation8], 0 }
   0xd   :  { %19 = vsyncpa [#allocation8 + $0x1], 0 }
   0xe   :  { %20 = vsyncpa [#allocation11], 0 }
   0xf   :  { %21 = vsyncpa [#allocation6], 0 }
  0x10   :  { %23 = vsyncpa [#allocation6 + $0x1], 0  ;;  %s2148_s30 = smov 0   ;;  %s2150_s10 = smov 0  }
  0x11   :  { %s2152_s11 = smov 0   ;;  %s2154_s12 = smov 0  }
  0x12   :  { %s2156_s13 = smov 0   ;;  %s2158_s14 = smov 0  }
  0x13   :  { %s2160_s15 = smov 0   ;;  %s2162_s16 = smov 0  }
  0x14   :  { %s2164_s17 = smov 0   ;;  %s2166_s18 = smov 0  }
  0x15   :  { %s2168_s19 = smov 0  }
  0x16 LB: > { %2592 = sst [smem:[#allocation18_spill]] %s2034_s12  ;;  %s2204_s20 = sadd.s32 4294967295, %s2062_s19   ;;  %s2062_s19 = sphi %s2168_s19, %s29_s19   ;;  %s2058_s18 = sphi %s2166_s18, %s2628_s18   ;;  %s2054_s17 = sphi %s2164_s17, %s2627_s17   ;;  %s2050_s16 = sphi %s2162_s16, %s2626_s16   ;;  %s2046_s15 = sphi %s2160_s15, %s2625_s15   ;;  %s2042_s14 = sphi %s2158_s14, %s2634_s14   ;;  %s2038_s13 = sphi %s2156_s13, %s2633_s13   ;;  %s2034_s12 = sphi %s2154_s12, %s2632_s12   ;;  %s2030_s11 = sphi %s2152_s11, %s2631_s11   ;;  %s2026_s10 = sphi %s2150_s10, %s2630_s10   ;;  %s2022_s30 = sphi %s2148_s30, %s2629_s30  }
  0x17   : > { %2593 = sst [smem:[#allocation19_spill]] %s2050_s16  ;;  %s1500_s21 = sadd.s32 4294967294, %s2062_s19  }
  0x18   : > { %2594 = sst [smem:[#allocation20_spill]] %s2054_s17  ;;  %p55_p0 = scmp.ne.s32.totalorder %s2042_s14, %s2038_s13 }
  0x19   : > { %2595 = sst [smem:[#allocation21_spill]] %s2058_s18  ;;  %p56_p1 = scmp.eq.s32.totalorder %s2062_s19, 0 }
  0x1a   : > { %p61_p2 = scmp.ne.s32.totalorder %s2038_s13, %s2034_s12  ;;  %p62_p3 = scmp.eq.s32.totalorder %s2204_s20, 0 }
  0x1b   : > { %p57_p4 = por %p56_p1, %p55_p0  ;;  %p283_p5 = scmp.eq.s32.totalorder %s2204_s20, 3 }
  0x1c   : > { %p2220_p6 = por %p62_p3, %p61_p2  ;;  %p289_p7 = scmp.eq.s32.totalorder %s1500_s21, 3 }
  0x1d   : > { %p2224_p8 = por %p283_p5, %p55_p0  ;;  %p1643_p10 = scmp.lt.s32.totalorder %s2062_s19, 4 }
  0x1e   : > { %p2228_p9 = por %p289_p7, %p61_p2  ;;  %s2234_s27 = sand.u32 1, %s2042_s14  }
  0x1f   : > { %s2597_s25 = scalar_select %p2224_p8, 1, 0 }
  0x20   : > { %s2599_s26 = scalar_select %p2228_p9, 1, 0 }
  0x21   : > { %2598 = sst [smem:[#allocation22_spill]] %s2597_s25  ;;  %s345_s28 = sand.u32 1, %s2062_s19  }
  0x22   : > { %2600 = sst [smem:[#allocation23_spill]] %s2599_s26  ;;  %p2239_p11 = pnand %p1643_p10, %p57_p4 }
  0x23   : > { %s2602_s1 = sld [smem:[#allocation27_spill]]  ;;  %s348_s12 = scalar_lea.vmem [#allocation7], %s2234_s27 }
  0x24   : > { %s355_s9 = sshll.u32 %s348_s12, 4  ;;  %s2248_s25 = scalar_lea.sflag [#allocation8], %s345_s28  ;;  %s356_s9 = int_to_ptr.vmem [resolvable:$true] %s355_s9 }
  0x25   : > { %p1501_p12 = scmp.ge.s32.totalorder %s2062_s19, 1  ;;  %p296_p13 = scmp.lt.s32.totalorder %s2062_s19, 5 }
  0x26   : > { %s2603_s7 = sld [smem:[#allocation32_spill]]  ;;  %s2064_s12 = smov [#allocation10]  }
  0x27   : > { %p2258_p0 = pnand %p1501_p12, %p296_p13  ;;  %s1505_s8 = sshll.u32 %s2058_s18, 3 }
  0x28   : > { %s2605_s0 = sld [smem:[#allocation26_spill]]  ;;  %s327_s3 = scalar_lea.sflag [#allocation5], %s2234_s27 }
  0x29   : > { %s351_s22 = scalar_lea.hbm %s2602_s1, %s2058_s18  ;;  %p1624_p2 = pneg %p2258_p0 }
  0x2a   : > { %s353_s26 = sshll.u32 %s351_s22, 4  ;;  %s309_s22 = sshll.u32 %s2064_s12, 4  ;;  %s354_s26 = int_to_ptr.hbm [resolvable:$true] %s353_s26  ;;  %s310_s22 = int_to_ptr.vmem [resolvable:$true] %s309_s22 }
  0x2b   : > { %1634 = dma.hbm_to_vmem [thread:$0]  (!%p2239_p11), %s354_s26, 16, %s356_s9, %s2248_s25  }
  0x2c   : > { %s307_s23 = sshll.u32 %s2603_s7, 4  ;;  %p1625_p4 = pnand %p1624_p2, %p62_p3  ;;  %s308_s23 = int_to_ptr.hbm [resolvable:$true] %s307_s23 }
  0x2d   : > { %s1504_s9 = sshll.u32 %s2234_s27, 3  ;;  %s2065_s12 = smov 64  }
  0x2e   : > { %s334_s28 = scalar_lea.hbm %s2605_s0, %s1505_s8  ;;  %s2066_s1 = smov 4  }
  0x2f   : > { %1627 = dma.hbm_to_vmem [thread:$0]  (!%p1625_p4), %s308_s23, 256, %s310_s22, [#allocation11], %s2065_s12, %s2065_s12, %s2066_s1  }
  0x30   : > { %s336_s7 = sshll.u32 %s334_s28, 4  ;;  %s330_s5 = scalar_lea.vmem [#allocation4], %s1504_s9  ;;  %s337_s7 = int_to_ptr.hbm [resolvable:$true] %s336_s7 }
  0x31   : > { %s338_s4 = sshll.u32 %s330_s5, 4  ;;  %s38_s16 = sadd.s32 1, %s2054_s17  ;;  %s339_s4 = int_to_ptr.vmem [resolvable:$true] %s338_s4 }
  0x32   : > { %1631 = dma.hbm_to_vmem [thread:$0]  (!%p2239_p11), %s337_s7, 128, %s339_s4, %s327_s3  }
  0x33   : > { %s204_s8 = sadd.s32 1, %s2030_s11  ;;  %p39_p5 = scmp.ge.s32.totalorder %s38_s16, 2 }
  0x34   : > { %p211_p7 = scmp.ne.s32.totalorder %s2030_s11, %s2026_s10  ;;  %p217_p12 = scmp.ne.s32.totalorder %s2026_s10, %s2022_s30 }
  0x35   : > { %s396_s1 = sand.u32 1, %s2030_s11   ;;  %s2636_s16 = smov (%p39_p5, %s38_s16), 0 }
  0x36   : > { %2606 = sst [smem:[#allocation24_spill]] %s2636_s16  ;;  %s2607_s23 = sadd.s32 1, %s2058_s18 }
  0x37   : > { %s2638_s23 = smov (!%p39_p5, %s2607_s23), %s2058_s18  ;;  %s201_s5 = ssub.s32 %s2054_s17, %s2636_s16 }
  0x38   : > { %p2290_p13 = por %p211_p7, %p56_p1  ;;  %p43_p11 = scmp.ge.s32.totalorder %s2638_s23, 2 }
  0x39   : > { %p202_p2 = scmp.eq.s32.totalorder %s201_s5, 0  ;;  %p2296_p4 = por %p217_p12, %p62_p3 }
  0x3a   : > { %s1506_s7 = sshll.u32 %s396_s1, 3  ;;  %s2640_s23 = smov (%p43_p11, %s2638_s23), 0 }
  0x3b   : > { %2610 = sst [smem:[#allocation25_spill]] %s2640_s23  ;;  %s45_s27 = ssub.s32 %s2058_s18, %s2640_s23 }
  0x3c   : > { %s2303_s30 = scalar_select %p202_p2, %s2030_s11, %s204_s8  }
  0x3d   : > { %p46_p1 = scmp.eq.s32.totalorder %s45_s27, 0  ;;  %s1507_s29 = sshll.u32 %s2054_s17, 3 }
  0x3e   : > { %s2611_s6 = sld [smem:[#allocation31_spill]]  ;;  %s398_s28 = scalar_lea.vmem [#allocation9], %s1506_s7 }
  0x3f   : > { %s406_s12 = sshll.u32 %s398_s28, 4  ;;  %s2612_s5 = sadd.s32 1, %s2042_s14  ;;  %s407_s12 = int_to_ptr.vmem [resolvable:$true] %s406_s12 }
  0x40   : > { %s2314_s0 = scalar_select %p46_p1, %s2042_s14, %s2612_s5  }
  0x41   : > { %p1635_p5 = pnand %p1643_p10, %p2290_p13  ;;  %s2324_s8 = sand.u32 (!%p2258_p0), 1, %s2038_s13  }
  0x42   : > { %415 = sbr.rel (%p2258_p0) target bundleno = 2194 (0x892), region = 56  ;;  %s1509_s1 = sshll.u32 (!%p2258_p0), %s2324_s8, 3 }
  0x43   : > { %s418_s7 = scalar_lea.sflag (!%p2258_p0), [#allocation5], %s2324_s8  ;;  %s421_s27 = scalar_lea.vmem (!%p2258_p0), [#allocation4], %s1509_s1 }
  0x44   : > { %s402_s26 = scalar_lea.hbm %s2611_s6, %s1507_s29 }
  0x45   : > { %s404_s16 = sshll.u32 %s402_s26, 4  ;;  %s405_s16 = int_to_ptr.hbm [resolvable:$true] %s404_s16 }
  0x46   : > { %1637 = dma.hbm_to_vmem [thread:$0]  (!%p1635_p5), %s405_s16, 128, %s407_s12, %s2248_s25  }
  0x47   : > { %2001 = dma.done.wait (%p2220_p6), %s418_s7, 128  }
  0x48   : > { %2003 = vsyncadd (%p2220_p6), %s418_s7, 4294967168  ;;  %s427_s25 = sand.u32 1, %s2204_s20  }
  0x49   : > { %s428_s21 = scalar_lea.sflag [#allocation8], %s427_s25 }
  0x4a   : > { %2005 = dma.done.wait (%p2220_p6), %s428_s21, 16  }
  0x4b   : > { %2007 = vsyncadd (%p2220_p6), %s428_s21, 4294967280  ;;  %s438_s3 = sand.u32 1, %s2026_s10  }
  0x4c   : > { %s2339_s29 = sshll.u32 %s438_s3, 3 }
  0x4d   : > { %s440_s22 = scalar_lea.vmem [#allocation9], %s2339_s29 }
  0x4e   : > { %2009 = dma.done.wait (%p2296_p4), %s428_s21, 128  }
  0x4f   : > { %2011 = vsyncadd (%p2296_p4), %s428_s21, 4294967168 }
  0x50   : > { %2013 = dma.done.wait (%p62_p3), [#allocation11], 256  }
  0x51   : > { %2015 = vsyncadd (%p62_p3), [#allocation11], 4294967040  ;;  %p510_p6 = scmp.lt.s32.totalorder %s2046_s15, 1  ;;  %s2613_s4 = sld [smem:[#allocation28_spill]] }
  0x52   : > { %s2614_s16 = sld [smem:[#allocation29_spill]]  ;;  %p1521_p3 = scmp.ne.s32.totalorder %s2046_s15, 0 }
  0x53   : > { %s511_s24 = scalar_select %p510_p6, %s2046_s15, 1 }
  0x54   : > { %s2615_s18 = sld [smem:[#allocation30_spill]] }
  0x55   : > { %s1596_s9 = sshll.u32 %s511_s24, 4  ;;  %s1599_s26 = sshll.u32 %s511_s24, 5 }
  0x56   : > { %s514_s5 = scalar_lea.vmem %s2566_s2, %s1596_s9  ;;  %s2370_s24 = scalar_lea.vmem [#allocation12], %s1509_s1 }
  0x57   : > { %s2358_s21 = scalar_lea.vmem %s2613_s4, %s1596_s9  ;;  %534 = sbr.rel (%p1521_p3) target bundleno = 94 (0x5e), region = 76 }
  0x58   : > { %s2363_s20 = scalar_lea.vmem %s2614_s16, %s1596_s9 }
  0x5a   : > { %s2368_s17 = scalar_lea.vmem %s2615_s18, %s1599_s26 }
  0x5c   : > { %v535_v0 = vld [vmem:[%s421_s27] sm:$0xff]  ;;  %vm536_vm0 = vcmask 261120  }
  0x5d   : > { %537 = vst.msk [vmem:[#allocation2] sm:$0xff] %vm536_vm0, %v535_v0 }
  0x5e PF: > { %v1601_v1 = vld [vmem:[%s514_s5 + $0x8] sm:$0xff]  ;;  %v1600_v2 = vld [vmem:[%s514_s5] sm:$0xff]  ;;  %vm558_vm1 = vcmask 261120   ;;  %s2067_s6 = smov 96   ;;  %s2068_s18 = smov 116   ;;  %vm587_vm2 = vcmask 31744  }
  0x5f   : > { %568 = vmatpush.bf16.msra.mxu0 %v1601_v1  ;;  %v2378_v5 = vld [vmem:[%s440_s22] sm:$0xff]  ;;  %s2069_s23 = smov 124   ;;  %s2070_s1 = smov 92   ;;  %vm607_vm3 = vcmask 64512   ;;  %vm625_vm4 = vcmask 1043456   ;;  %vm706_vm5 = vcmask 64544  }
  0x60   : > { %v545_v6 = vperm.slane %v2378_v5, 0  ;;  %s2071_s27 = smov 88   ;;  %s2072_s16 = smov 84   ;;  %vm768_vm6 = vcmask 97344   ;;  %vm830_vm7 = vcmask 130144   ;;  %vm892_vm8 = vcmask 162944  }
  0x61   : > { %s2073_s22 = smov 76   ;;  %s2074_s9 = smov 108   ;;  %vm954_vm9 = vcmask 195744   ;;  %vm1016_vm10 = vcmask 228544   ;;  %vm1078_vm11 = vcmask 261344   ;;  %vm1218_vm0 = vcmask 523264  }
  0x62   : > { %s2075_s26 = smov 120   ;;  %s2076_s28 = smov 80  }
  0x63   : > { %569 = vmatpush.bf16.msra.mxu0 %v1600_v2  ;;  %s2077_s12 = smov 112   ;;  %s2078_s5 = smov 68  }
  0x64   : > { %v2373_v3 = vld [vmem:[#allocation2] sm:$0xff]  ;;  %s2079_s7 = smov 100   ;;  %s2080_s25 = smov 104  }
  0x65   : > { %v540_v4 = vpack.c.bf16 %v2373_v3, %v2373_v3  ;;  %s2081_s4 = smov 72   ;;  %s2082_s3 = smov 60  }
  0x66   : > { %s2616_s29 = scalar_lea.vmem [#allocation7], %s2324_s8  ;;  %p1582_p10 = scmp.ne.s32.totalorder %s2046_s15, 1 }
  0x67   : > { %1530 = vmatmul.msk.bf16.vlgmr.msra.gmra.mxu0 %vm558_vm1, %v540_v4  ;;  %v1768_v40 = vld [vmem:[%s2616_s29] ss:$0 sm:$0xff] }
  0xe4   : > { %v571_v7 = vpop.f32.mrf.mxu0 }
  0xe5   : > { %v572_v8 = vadd.f32 %v571_v7, %v545_v6 }
  0xe7   : > { %v575_v9 = vmul.f32 0.5, %v572_v8  ;;  %v577_v10 = vpack.c.bf16 %v572_v8, %v572_v8 }
  0xe9   : > { %v576_v11 = vpack.c.bf16 %v575_v9, %v575_v9  ;;  %v583_v12 = vunpack.c.l.b16 %v577_v10 }
  0xeb   : > { %v2381_v13 = vpack.c.b16 %v583_v12, %v583_v12  ;;  %v644_v14 = vunpack.c.l.b16 %v576_v11 }
  0xec   : > { %v573_v15 = vpop.f32.mrf.mxu0 }
  0xed   : > { %v645_v16 = vpack.c.b16 %v644_v14, %v644_v14  ;;  %585 = vrot.lane.b32.xlu0 %v2381_v13, %s2067_s6  ;;  %s2083_s6 = smov 64  }
  0xef   : > { %770 = vrot.lane.b32.xlu2 %v645_v16, %s2068_s18  ;;  %646 = vrot.lane.b32.xlu1 %v645_v16, %s2069_s23  ;;  %s2084_s18 = smov 52   ;;  %s2085_s23 = smov 44  }
  0xf5   : > { %648 = vrot.lane.b32.xlu0 %v2381_v13, %s2070_s1  ;;  %s2086_s1 = smov 56  }
  0xf7   : > { %710 = vrot.lane.b32.xlu2 %v2381_v13, %s2071_s27  ;;  %772 = vrot.lane.b32.xlu1 %v2381_v13, %s2072_s16  ;;  %s2087_s27 = smov 48   ;;  %s2088_s16 = smov 36  }
  0xfd   : > { %896 = vrot.lane.b32.xlu0 %v2381_v13, %s2073_s22  ;;  %s2089_s22 = smov 40  }
  0xff   : > { %894 = vrot.lane.b32.xlu2 %v645_v16, %s2074_s9  ;;  %708 = vrot.lane.b32.xlu1 %v645_v16, %s2075_s26  ;;  %s2090_s9 = smov 8   ;;  %s2091_s26 = smov 4  }
 0x105   : > { %834 = vrot.lane.b32.xlu0 %v2381_v13, %s2076_s28  ;;  %s2092_s28 = smov 16  }
 0x107   : > { %832 = vrot.lane.b32.xlu2 %v645_v16, %s2077_s12  ;;  %1020 = vrot.lane.b32.xlu1 %v2381_v13, %s2078_s5  ;;  %s2093_s12 = smov 12   ;;  %s2094_s5 = smov 24  }
 0x10d   : > { %1018 = vrot.lane.b32.xlu0 %v645_v16, %s2079_s7  ;;  %s2095_s7 = smov 20  }
 0x10f   : > { %956 = vrot.lane.b32.xlu2 %v645_v16, %s2080_s25  ;;  %958 = vrot.lane.b32.xlu1 %v2381_v13, %s2081_s4  ;;  %s2096_s25 = smov 28  }
 0x117   : > { %681 = vrot.lane.b32.xlu2 %v2381_v13, %s2082_s3 }
 0x149   : > { %v771_v17 = vpop.permute.xlu2 %770 }
 0x151   : > { %v711_v18 = vpop.permute.xlu2 %710 }
 0x152   : > { %v716_v19 = vsel %vm587_vm2, %v711_v18, 0 }
 0x153   : > { %725 = vmatpush.bf16.xpose.msrb.mxu0 %v716_v19 }
 0x159   : > { %v895_v30 = vpop.permute.xlu2 %894 }
 0x15f   : > { %v586_v20 = vpop.permute.xlu0 %585 }
 0x160   : > { %v592_v21 = vsel %vm587_vm2, %v586_v20, 0 }
 0x161   : > { %601 = vmatpush.bf16.xpose.msra.mxu1 %v592_v21  ;;  %v647_v22 = vpop.permute.xlu1 %646  ;;  %v833_v35 = vpop.permute.xlu2 %832 }
 0x167   : > { %v649_v23 = vpop.permute.xlu0 %648 }
 0x168   : > { %1531 = vmatmul.msk.bf16.vlgmr.msra.gmra.mxu1 %vm587_vm2, %v576_v11  ;;  %v654_v24 = vsel %vm587_vm2, %v649_v23, 0 }
 0x169   : > { %663 = vmatpush.bf16.xpose.msra.mxu3 %v654_v24  ;;  %v773_v25 = vpop.permute.xlu1 %772  ;;  %v957_v38 = vpop.permute.xlu2 %956 }
 0x16a   : > { %v778_v26 = vsel %vm587_vm2, %v773_v25, 0 }
 0x16f   : > { %v897_v27 = vpop.permute.xlu0 %896 }
 0x170   : > { %v902_v28 = vsel %vm587_vm2, %v897_v27, 0  ;;  %1533 = vmatmul.msk.bf16.vlgmr.msra.gmra.mxu3 %vm587_vm2, %v647_v22 }
 0x171   : > { %787 = vmatpush.bf16.xpose.msrb.mxu3 %v778_v26  ;;  %v709_v29 = vpop.permute.xlu1 %708  ;;  %v682_v14 = vpop.permute.xlu2 %681 }
 0x172   : > { %1535 = vmatmul.msk.bf16.vlgmr.msrb.gmra.mxu0 %vm587_vm2, %v709_v29  ;;  %v687_v27 = vsel %vm625_vm4, %v682_v14, 0 }
 0x177   : > { %v835_v31 = vpop.permute.xlu0 %834 }
 0x178   : > { %v840_v32 = vsel %vm587_vm2, %v835_v31, 0 }
 0x179   : > { %911 = vmatpush.bf16.xpose.msra.mxu3 %v902_v28  ;;  %849 = vmatpush.bf16.xpose.msra.mxu0 %v840_v32  ;;  %v1021_v33 = vpop.permute.xlu1 %1020 }
 0x17a   : > { %v1026_v34 = vsel %vm587_vm2, %v1021_v33, 0 }
 0x17f   : > { %v1019_v39 = vpop.permute.xlu0 %1018 }
 0x180   : > { %1537 = vmatmul.msk.bf16.vlgmr.msrb.gmra.mxu3 %vm587_vm2, %v771_v17 }
 0x181   : > { %1035 = vmatpush.bf16.xpose.msrb.mxu3 %v1026_v34  ;;  %v959_v36 = vpop.permute.xlu1 %958 }
 0x182   : > { %v964_v37 = vsel %vm587_vm2, %v959_v36, 0  ;;  %1539 = vmatmul.msk.bf16.vlgmr.msra.gmra.mxu0 %vm587_vm2, %v833_v35 }
 0x183   : > { %973 = vmatpush.bf16.xpose.msrb.mxu0 %v964_v37 }
 0x190   : > { %1541 = vmatmul.msk.bf16.vlgmr.msra.gmra.mxu3 %vm587_vm2, %v895_v30 }
 0x192   : > { %1543 = vmatmul.msk.bf16.vlgmr.msrb.gmra.mxu0 %vm587_vm2, %v957_v38 }
 0x1a0   : > { %1545 = vmatmul.msk.bf16.vlgmr.msrb.gmra.mxu3 %vm587_vm2, %v1019_v39 }
 0x1e5   : > { %v603_v41 = vpop.f32.mrf.mxu1 }
 0x1e6   : > { %v604_v42 = vadd.f32 %v1768_v40, %v603_v41 }
 0x1e8   : > { %v608_v43 = vsel %vm607_vm3, %v604_v42, -inf }
 0x1e9   : > { %609 = vmax.xlane.f32.xlu0 %v608_v43 }
 0x1ed   : > { %v605_v44 = vpop.f32.mrf.mxu1 }
 0x1ef   : > { %v727_v45 = vpop.f32.mrf.mxu0 }
 0x1f0   : > { %v728_v46 = vadd.f32 %v1768_v40, %v727_v45 }
 0x1f2   : > { %v731_v47 = vsel %vm607_vm3, %v728_v46, -inf }
 0x1f3   : > { %v665_v48 = vpop.f32.mrf.mxu3  ;;  %732 = vmax.xlane.f32.xlu2 %v731_v47 }
 0x1f4   : > { %v666_v49 = vadd.f32 %v1768_v40, %v665_v48 }
 0x1f6   : > { %v669_v50 = vsel %vm607_vm3, %v666_v49, -inf }
 0x1f7   : > { %670 = vmax.xlane.f32.xlu1 %v669_v50  ;;  %v729_v51 = vpop.f32.mrf.mxu0 }
 0x1fb   : > { %v667_v52 = vpop.f32.mrf.mxu3 }
 0x1fd   : > { %620 = vrot.lane.b32.xlu0 %v2381_v13, %s2083_s6 }
 0x1ff   : > { %v851_v53 = vpop.f32.mrf.mxu0 }
 0x200   : > { %v852_v54 = vadd.f32 %v1768_v40, %v851_v53 }
 0x202   : > { %v855_v55 = vsel %vm607_vm3, %v852_v54, -inf }
 0x203   : > { %v789_v56 = vpop.f32.mrf.mxu3  ;;  %856 = vmax.xlane.f32.xlu2 %v855_v55 }
 0x204   : > { %v2415_v57 = vadd.f32 %v1768_v40, %v789_v56 }
 0x206   : > { %v793_v59 = vsel %vm607_vm3, %v2415_v57, -inf }
 0x207   : > { %v853_v58 = vpop.f32.mrf.mxu0 }
 0x20b   : > { %v791_v60 = vpop.f32.mrf.mxu3  ;;  %794 = vmax.xlane.f32.xlu2 %v793_v59 }
 0x20f   : > { %v975_v61 = vpop.f32.mrf.mxu0 }
 0x210   : > { %v2419_v62 = vadd.f32 %v1768_v40, %v975_v61 }
 0x212   : > { %v979_v63 = vsel %vm607_vm3, %v2419_v62, -inf }
 0x213   : > { %v913_v0 = vpop.f32.mrf.mxu3  ;;  %980 = vmax.xlane.f32.xlu1 %v979_v63 }
 0x214   : > { %v914_v4 = vadd.f32 %v1768_v40, %v913_v0 }
 0x216   : > { %v917_v9 = vsel %vm607_vm3, %v914_v4, -inf }
 0x217   : > { %v977_v1 = vpop.f32.mrf.mxu0 }
 0x21b   : > { %v915_v2 = vpop.f32.mrf.mxu3 }
 0x223   : > { %v1037_v6 = vpop.f32.mrf.mxu3 }
 0x224   : > { %v2423_v7 = vadd.f32 %v1768_v40, %v1037_v6 }
 0x226   : > { %v1041_v8 = vsel %vm607_vm3, %v2423_v7, -inf }
 0x227   : > { %1042 = vmax.xlane.f32.xlu1 %v1041_v8  ;;  %918 = vmax.xlane.f32.xlu0 %v917_v9 }
 0x22b   : > { %v1039_v10 = vpop.f32.mrf.mxu3 }
 0x25c   : > { %v610_v11 = vpop.xlane.xlu0 %609 }
 0x25d   : > { %v611_v12 = vsub.f32 %v604_v42, %v610_v11 }
 0x25f   : > { %v612_v15 = vmul.f32 1.442695, %v611_v12 }
 0x261   : > { %1769 = vpow2.f32 %v612_v15 }
 0x266   : > { %v733_v16 = vpop.xlane.xlu2 %732 }
 0x267   : > { %v2428_v17 = vpop.eup %1769  ;;  %v734_v18 = vsub.f32 %v728_v46, %v733_v16 }
 0x268   : > { %v614_v19 = vsel %vm607_vm3, %v2428_v17, 0.0 }
 0x269   : > { %v735_v20 = vmul.f32 1.442695, %v734_v18  ;;  %615 = vadd.xlane.f32.xlu1 %v614_v19 }
 0x26a   : > { %v671_v21 = vpop.xlane.xlu1 %670 }
 0x26b   : > { %1771 = vpow2.f32 %v735_v20  ;;  %v672_v22 = vsub.f32 %v666_v49, %v671_v21 }
 0x26d   : > { %v673_v23 = vmul.f32 1.442695, %v672_v22 }
 0x26f   : > { %1773 = vpow2.f32 %v673_v23  ;;  %v621_v24 = vpop.permute.xlu0 %620 }
 0x270   : > { %v627_v25 = vsel %vm625_vm4, %v621_v24, 0 }
 0x271   : > { %v2433_v26 = vpop.eup %1771  ;;  %636 = vmatpush.bf16.msra.mxu2 %v627_v25 }
 0x272   : > { %v737_v28 = vsel %vm607_vm3, %v2433_v26, 0.0 }
 0x273   : > { %738 = vadd.xlane.f32.xlu0 %v737_v28 }
 0x275   : > { %696 = vmatpush.bf16.msrb.mxu2 %v687_v27  ;;  %v2438_v29 = vpop.eup %1773 }
 0x276   : > { %v675_v30 = vsel %vm607_vm3, %v2438_v29, 0.0  ;;  %v857_v31 = vpop.xlane.xlu2 %856 }
 0x277   : > { %676 = vadd.xlane.f32.xlu2 %v675_v30  ;;  %v858_v32 = vsub.f32 %v852_v54, %v857_v31 }
 0x279   : > { %v859_v33 = vmul.f32 1.442695, %v858_v32 }
 0x27b   : > { %1775 = vpow2.f32 %v859_v33 }
 0x27e   : > { %v795_v34 = vpop.xlane.xlu2 %794 }
 0x27f   : > { %v796_v35 = vsub.f32 %v2415_v57, %v795_v34 }
 0x281   : > { %v797_v38 = vmul.f32 1.442695, %v796_v35  ;;  %v1776_v41 = vpop.eup %1775 }
 0x282   : > { %805 = vrot.lane.b32.xlu1 %v2381_v13, %s2084_s18  ;;  %v861_v45 = vsel %vm607_vm3, %v1776_v41, 0.0 }
 0x283   : > { %1777 = vpow2.f32 %v797_v38 }
 0x286   : > { %v981_v36 = vpop.xlane.xlu1 %980 }
 0x287   : > { %929 = vrot.lane.b32.xlu0 %v2381_v13, %s2085_s23  ;;  %v982_v40 = vsub.f32 %v2419_v62, %v981_v36 }
 0x289   : > { %v983_v43 = vmul.f32 1.442695, %v982_v40  ;;  %v1778_v47 = vpop.eup %1777 }
 0x28a   : > { %v799_v49 = vsel %vm607_vm3, %v1778_v47, 0.0 }
 0x28f   : > { %743 = vrot.lane.b32.xlu2 %v2381_v13, %s2086_s1  ;;  %867 = vrot.lane.b32.xlu0 %v2381_v13, %s2087_s27 }
 0x29a   : > { %v919_v37 = vpop.xlane.xlu0 %918  ;;  %v1043_v44 = vpop.xlane.xlu1 %1042 }
 0x29b   : > { %v920_v39 = vsub.f32 %v914_v4, %v919_v37  ;;  %v1044_v46 = vsub.f32 %v2423_v7, %v1043_v44 }
 0x29d   : > { %v921_v42 = vmul.f32 1.442695, %v920_v39  ;;  %v1045_v48 = vmul.f32 1.442695, %v1044_v46 }
 0x29f   : > { %1779 = vpow2.f32 %v921_v42 }
 0x2a0   : > { %1781 = vpow2.f32 %v983_v43 }
 0x2a1   : > { %1783 = vpow2.f32 %v1045_v48 }
 0x2a5   : > { %v2451_v50 = vpop.eup %1779 }
 0x2a6   : > { %v1782_v51 = vpop.eup %1781  ;;  %v923_v52 = vsel %vm607_vm3, %v2451_v50, 0.0 }
 0x2a7   : > { %v985_v53 = vsel %vm607_vm3, %v1782_v51, 0.0  ;;  %v2456_v54 = vpop.eup %1783 }
 0x2a8   : > { %v1047_v55 = vsel %vm607_vm3, %v2456_v54, 0.0 }
 0x2ac   : > { %862 = vadd.xlane.f32.xlu1 %v861_v45 }
 0x2b4   : > { %800 = vadd.xlane.f32.xlu1 %v799_v49 }
 0x2b8   : > { %924 = vadd.xlane.f32.xlu2 %v923_v52 }
 0x2b9   : > { %986 = vadd.xlane.f32.xlu0 %v985_v53 }
 0x2c0   : > { %1048 = vadd.xlane.f32.xlu2 %v1047_v55 }
 0x2cd   : > { %1053 = vrot.lane.b32.xlu1 %v2381_v13, %s2088_s16 }
 0x2d8   : > { %991 = vrot.lane.b32.xlu2 %v2381_v13, %s2089_s22 }
 0x2dc   : > { %v616_v56 = vpop.xlane.xlu1 %615 }
 0x2dd   : > { %1785 = vrcp.f32 %v616_v56  ;;  %v1603_v56 = vld [vmem:[%s2358_s21 + $0x8] sm:$0xff] }
 0x2de   : > { %1108 = vmatpush.bf16.msra.mxu0 %v1603_v56 }
 0x2e3   : > { %v1786_v57 = vpop.eup %1785 }
 0x2e4   : > { %v618_v58 = vmul.f32 %v1786_v57, %v2428_v17  ;;  %v1602_v57 = vld [vmem:[%s2358_s21] sm:$0xff] }
 0x2e5   : > { %1109 = vmatpush.bf16.msra.mxu0 %v1602_v57 }
 0x2e6   : > { %v739_v59 = vpop.xlane.xlu0 %738  ;;  %v619_v60 = vpack.c.bf16 %v618_v58, %v618_v58 }
 0x2e7   : > { %1787 = vrcp.f32 %v739_v59 }
 0x2e8   : > { %1532 = vmatmul.msk.bf16.vlgmr.msra.gmra.mxu2 %vm607_vm3, %v619_v60 }
 0x2ea   : > { %v677_v61 = vpop.xlane.xlu2 %676 }
 0x2eb   : > { %1789 = vrcp.f32 %v677_v61 }
 0x2ed   : > { %v1788_v62 = vpop.eup %1787 }
 0x2ee   : > { %v741_v0 = vmul.f32 %v1788_v62, %v2433_v26 }
 0x2f0   : > { %v742_v7 = vpack.c.bf16 %v741_v0, %v741_v0 }
 0x2f1   : > { %v1790_v63 = vpop.eup %1789 }
 0x2f2   : > { %v679_v1 = vmul.f32 %v1790_v63, %v2438_v29  ;;  %v744_v2 = vpop.permute.xlu2 %743 }
 0x2f3   : > { %v749_v13 = vsel %vm625_vm4, %v744_v2, 0 }
 0x2f4   : > { %758 = vmatpush.bf16.msrb.mxu1 %v749_v13  ;;  %v806_v4 = vpop.permute.xlu1 %805  ;;  %v680_v8 = vpack.c.bf16 %v679_v1, %v679_v1  ;;  %v1086_v1 = vperm.slane %v2378_v5, 1 }
 0x2f5   : > { %v811_v6 = vsel %vm625_vm4, %v806_v4, 0 }
 0x2f6   : > { %820 = vmatpush.bf16.msra.mxu2 %v811_v6 }
 0x2f7   : > { %1536 = vmatmul.msk.bf16.vlgmr.msrb.gmra.mxu1 %vm607_vm3, %v742_v7 }
 0x2f8   : > { %1534 = vmatmul.msk.bf16.vlgmr.msrb.gmra.mxu2 %vm607_vm3, %v680_v8  ;;  %v2097_v8 = vmov 32.0  }
 0x2f9   : > { %v930_v9 = vpop.permute.xlu0 %929 }
 0x2fa   : > { %v935_v10 = vsel %vm625_vm4, %v930_v9, 0 }
 0x2fb   : > { %944 = vmatpush.bf16.msrb.mxu2 %v935_v10 }
 0x301   : > { %v868_v11 = vpop.permute.xlu0 %867 }
 0x302   : > { %v873_v12 = vsel %vm625_vm4, %v868_v11, 0 }
 0x303   : > { %882 = vmatpush.bf16.msra.mxu1 %v873_v12 }
 0x31f   : > { %v863_v14 = vpop.xlane.xlu1 %862 }
 0x320   : > { %1791 = vrcp.f32 %v863_v14 }
 0x326   : > { %v1792_v15 = vpop.eup %1791 }
 0x327   : > { %v865_v16 = vmul.f32 %v1792_v15, %v1776_v41  ;;  %v801_v17 = vpop.xlane.xlu1 %800 }
 0x328   : > { %1793 = vrcp.f32 %v801_v17 }
 0x329   : > { %v866_v18 = vpack.c.bf16 %v865_v16, %v865_v16 }
 0x32b   : > { %v925_v19 = vpop.xlane.xlu2 %924  ;;  %1540 = vmatmul.msk.bf16.vlgmr.msra.gmra.mxu1 %vm607_vm3, %v866_v18 }
 0x32c   : > { %v987_v21 = vpop.xlane.xlu0 %986 }
 0x32d   : > { %1795 = vrcp.f32 %v987_v21  ;;  %v1604_v21 = vld [vmem:[%s2363_s20] sm:$0xff] }
 0x32e   : > { %v1794_v20 = vpop.eup %1793  ;;  %1797 = vrcp.f32 %v925_v19 }
 0x32f   : > { %v803_v22 = vmul.f32 %v1794_v20, %v1778_v47  ;;  %v1605_v20 = vld [vmem:[%s2363_s20 + $0x8] sm:$0xff]  ;;  %s2617_s20 = sld [smem:[#allocation33_spill]] (!%p1582_p10) }
 0x331   : > { %v804_v23 = vpack.c.bf16 %v803_v22, %v803_v22  ;;  %v1609_v22 = vld [vmem:[%s2368_s17 + $0x18] sm:$0xff] }
 0x332   : > { %1226 = vmatpush.bf16.msra.mxu3 %v1609_v22 }
 0x333   : > { %1538 = vmatmul.msk.bf16.vlgmr.msra.gmra.mxu2 %vm607_vm3, %v804_v23  ;;  %v1049_v24 = vpop.xlane.xlu2 %1048  ;;  %v1796_v25 = vpop.eup %1795 }
 0x334   : > { %v1798_v26 = vpop.eup %1797  ;;  %v989_v27 = vmul.f32 %v1796_v25, %v1782_v51  ;;  %1799 = vrcp.f32 %v1049_v24  ;;  %v1608_v25 = vld [vmem:[%s2368_s17 + $0x10] sm:$0xff] }
 0x335   : > { %v927_v30 = vmul.f32 %v1798_v26, %v2451_v50  ;;  %1801 = vrcp.f32 %v2097_v8 }
 0x336   : > { %v990_v31 = vpack.c.bf16 %v989_v27, %v989_v27  ;;  %1227 = vmatpush.bf16.msra.mxu3 %v1608_v25 }
 0x337   : > { %v928_v34 = vpack.c.bf16 %v927_v30, %v927_v30 }
 0x33a   : > { %v1800_v35 = vpop.eup %1799 }
 0x33b   : > { %v992_v28 = vpop.permute.xlu2 %991  ;;  %v1051_v36 = vmul.f32 %v1800_v35, %v2456_v54  ;;  %v1802_v9 = vpop.eup %1801  ;;  %v1147_v35 = vperm.slane %v2378_v5, 5 }
 0x33c   : > { %v997_v29 = vsel %vm625_vm4, %v992_v28, 0  ;;  %v1120_v10 = vmul.f32 32.0, %v1802_v9  ;;  %vm1124_vm12 = vweird.f32 %v1802_v9 }
 0x33d   : > { %1006 = vmatpush.bf16.msrb.mxu1 %v997_v29  ;;  %v1052_v37 = vpack.c.bf16 %v1051_v36, %v1051_v36 }
 0x33e   : > { %v1121_v11 = vsub.f32 1.0, %v1120_v10 }
 0x33f   : > { %v1054_v32 = vpop.permute.xlu1 %1053 }
 0x340   : > { %v1059_v33 = vsel %vm625_vm4, %v1054_v32, 0  ;;  %1544 = vmatmul.msk.bf16.vlgmr.msrb.gmra.mxu1 %vm607_vm3, %v990_v31  ;;  %v1122_v12 = vmul.f32 %v1802_v9, %v1121_v11 }
 0x341   : > { %1068 = vmatpush.bf16.msra.mxu2 %v1059_v33  ;;  %1176 = vmatpush.bf16.msra.mxu1 %v1605_v20  ;;  %v1145_v33 = vperm.slane %v2378_v5, 4 }
 0x342   : > { %v1123_v14 = vadd.f32 %v1802_v9, %v1122_v12 }
 0x343   : > { %1542 = vmatmul.msk.bf16.vlgmr.msrb.gmra.mxu2 %vm607_vm3, %v928_v34 }
 0x344   : > { %v1125_v15 = vsel %vm1124_vm12, %v1802_v9, %v1123_v14 }
 0x345   : > { %1177 = vmatpush.bf16.msra.mxu1 %v1604_v21 }
 0x353   : > { %1546 = vmatmul.msk.bf16.vlgmr.msra.gmra.mxu2 %vm607_vm3, %v1052_v37 }
 0x36b   : > { %v638_v38 = vpop.f32.mrf.mxu2 }
 0x36c   : > { %642 = vst.msk [vmem:[#allocation3] sm:$0xff] %vm587_vm2, %v638_v38 }
 0x373   : > { %v640_v39 = vpop.f32.mrf.mxu2 }
 0x374   : > { %v760_v40 = vpop.f32.mrf.mxu1 }
 0x375   : > { %765 = vrot.lane.b32.xlu2 %v760_v40, %s2090_s9  ;;  %v1607_v40 = vld [vmem:[%s2368_s17 + $0x8] sm:$0xff] }
 0x376   : > { %1228 = vmatpush.bf16.msra.mxu3 %v1607_v40 }
 0x37b   : > { %v698_v41 = vpop.f32.mrf.mxu2 }
 0x37c   : > { %703 = vrot.lane.b32.xlu1 %v698_v41, %s2091_s26  ;;  %v762_v42 = vpop.f32.mrf.mxu1  ;;  %v1606_v41 = vld [vmem:[%s2368_s17] sm:$0xff] }
 0x37d   : > { %1229 = vmatpush.bf16.msra.mxu3 %v1606_v41  ;;  %v1154_v42 = vperm.slane %v2378_v5, 2 }
 0x383   : > { %v700_v43 = vpop.f32.mrf.mxu2 }
 0x3a8   : > { %v884_v44 = vpop.f32.mrf.mxu1 }
 0x3a9   : > { %889 = vrot.lane.b32.xlu2 %v884_v44, %s2092_s28 }
 0x3b0   : > { %v886_v45 = vpop.f32.mrf.mxu1 }
 0x3b6   : > { %v822_v46 = vpop.f32.mrf.mxu2 }
 0x3b7   : > { %827 = vrot.lane.b32.xlu1 %v822_v46, %s2093_s12 }
 0x3bd   : > { %v1008_v47 = vpop.f32.mrf.mxu1 }
 0x3be   : > { %v824_v48 = vpop.f32.mrf.mxu2 }
 0x3bf   : > { %1013 = vrot.lane.b32.xlu1 %v1008_v47, %s2094_s5  ;;  %v1193_v48 = vperm.slane %v2378_v5, 3 }
 0x3c5   : > { %v1010_v49 = vpop.f32.mrf.mxu1 }
 0x3c6   : > { %v946_v50 = vpop.f32.mrf.mxu2 }
 0x3c7   : > { %951 = vrot.lane.b32.xlu0 %v946_v50, %s2095_s7 }
 0x3ce   : > { %v948_v51 = vpop.f32.mrf.mxu2 }
 0x3cf   : > { %v766_v55 = vpop.permute.xlu2 %765 }
 0x3d6   : > { %v1070_v52 = vpop.f32.mrf.mxu2 }
 0x3d7   : > { %1075 = vrot.lane.b32.xlu2 %v1070_v52, %s2096_s25 }
 0x3de   : > { %v1072_v53 = vpop.f32.mrf.mxu2 }
 0x3ee   : > { %v704_v54 = vpop.permute.xlu1 %703 }
 0x3ef   : > { %707 = vst.msk [vmem:[#allocation3] sm:$0xff] %vm706_vm5, %v704_v54 }
 0x3f0   : > { %769 = vst.msk [vmem:[#allocation3] sm:$0xff] %vm768_vm6, %v766_v55 }
 0x403   : > { %v890_v59 = vpop.permute.xlu2 %889 }
 0x429   : > { %v828_v58 = vpop.permute.xlu1 %827 }
 0x42a   : > { %831 = vst.msk [vmem:[#allocation3] sm:$0xff] %vm830_vm7, %v828_v58 }
 0x42b   : > { %893 = vst.msk [vmem:[#allocation3] sm:$0xff] %vm892_vm8, %v890_v59 }
 0x431   : > { %v1014_v61 = vpop.permute.xlu1 %1013  ;;  %v1076_v62 = vpop.permute.xlu2 %1075 }
 0x439   : > { %v952_v60 = vpop.permute.xlu0 %951 }
 0x43a   : > { %955 = vst.msk [vmem:[#allocation3] sm:$0xff] %vm954_vm9, %v952_v60 }
 0x43b   : > { %1017 = vst.msk [vmem:[#allocation3] sm:$0xff] %vm1016_vm10, %v1014_v61 }
 0x43c   : > { %1079 = vst.msk [vmem:[#allocation3] sm:$0xff] %vm1078_vm11, %v1076_v62 }
 0x443   : > { %v1080_v63 = vld [vmem:[#allocation3] sm:$0xff] }
 0x444   : > { %v1081_v0 = vpack.c.bf16 %v1080_v63, %v1080_v63 }
 0x446   : > { %1555 = vmatmul.msk.bf16.vlgmr.msra.gmra.mxu0 %vm558_vm1, %v1081_v0 }
 0x4c3   : > { %v1111_v2 = vpop.f32.mrf.mxu0 }
 0x4c4   : > { %v1112_v13 = vadd.f32 %v1111_v2, %v1086_v1 }
 0x4c6   : > { %v1115_v4 = vadd.f32 %v1112_v13, %v2373_v3 }
 0x4c8   : > { %v1116_v6 = vsel %vm558_vm1, %v1115_v4, 0.0 }
 0x4c9   : > { %1117 = vadd.xlane.f32.xlu1 %v1116_v6 }
 0x4cb   : > { %v1113_v7 = vpop.f32.mrf.mxu0 }
 0x4cc   : > { %v1260_v7 = vperm.slane %v2378_v5, 7 }
 0x53c   : > { %v1118_v16 = vpop.xlane.xlu1 %1117 }
 0x53d   : > { %v1126_v17 = vmul.f32 %v1125_v15, %v1118_v16 }
 0x53f   : > { %v1127_v3 = vsub.f32 %v1115_v4, %v1126_v17  ;;  %v1258_v4 = vperm.slane %v2378_v5, 6 }
 0x541   : > { %v1128_v18 = vmul.f32 %v1127_v3, %v1127_v3 }
 0x543   : > { %v1129_v19 = vsel %vm558_vm1, %v1128_v18, 0.0 }
 0x544   : > { %1130 = vadd.xlane.f32.xlu2 %v1129_v19 }
 0x5b7   : > { %v1131_v23 = vpop.xlane.xlu2 %1130 }
 0x5b8   : > { %v1132_v24 = vmul.f32 %v1131_v23, %v1125_v15 }
 0x5ba   : > { %v1133_v26 = vadd.f32 1e-05, %v1132_v24 }
 0x5bc   : > { %1803 = vrsqrt.f32 %v1133_v26  ;;  %vm1140_vm14 = vweird.f32 %v1133_v26 }
 0x5c2   : > { %v1804_v27 = vpop.eup %1803 }
 0x5c3   : > { %v1135_v28 = vmul.f32 %v1804_v27, %v1133_v26  ;;  %vm1141_vm13 = vweird.f32 %v1804_v27 }
 0x5c4   : > { %vm1142_vm15 = vmor %vm1140_vm14, %vm1141_vm13 }
 0x5c5   : > { %v1136_v29 = vmul.f32 %v1804_v27, %v1135_v28 }
 0x5c7   : > { %v1137_v30 = vmul.f32 0.5, %v1136_v29 }
 0x5c9   : > { %v1138_v31 = vsub.f32 1.5, %v1137_v30 }
 0x5cb   : > { %v1139_v32 = vmul.f32 %v1804_v27, %v1138_v31 }
 0x5cd   : > { %v1143_v34 = vsel %vm1142_vm15, %v1804_v27, %v1139_v32 }
 0x5ce   : > { %v1144_v36 = vmul.f32 %v1143_v34, %v1127_v3 }
 0x5d0   : > { %v1146_v37 = vmul.f32 %v1145_v33, %v1144_v36 }
 0x5d2   : > { %v1148_v38 = vadd.f32 %v1147_v35, %v1146_v37 }
 0x5d4   : > { %v1149_v39 = vpack.c.bf16 %v1148_v38, %v1148_v38 }
 0x5d6   : > { %1564 = vmatmul.msk.bf16.vlgmr.msra.gmra.mxu1 %vm558_vm1, %v1149_v39 }
 0x653   : > { %v1179_v43 = vpop.f32.mrf.mxu1 }
 0x654   : > { %v1180_v44 = vadd.f32 %v1179_v43, %v1154_v42 }
 0x656   : > { %v1183_v45 = vmax.f32 %v1180_v44, 0.0 }
 0x658   : > { %v1184_v46 = vpack.c.bf16 %v1183_v45, %v1183_v45 }
 0x65a   : > { %1581 = vmatmul.msk.bf16.vlgmr.msra.gmra.mxu3 %vm1218_vm0, %v1184_v46 }
 0x65b   : > { %v1181_v47 = vpop.f32.mrf.mxu1 }
 0x6dd   : > { %v1231_v49 = vpop.f32.mrf.mxu3 }
 0x6de   : > { %v1232_v50 = vadd.f32 %v1231_v49, %v1193_v48 }
 0x6e0   : > { %v1235_v51 = vadd.f32 %v1232_v50, %v1148_v38 }
 0x6e2   : > { %v1236_v52 = vsel %vm558_vm1, %v1235_v51, 0.0 }
 0x6e3   : > { %1237 = vadd.xlane.f32.xlu0 %v1236_v52 }
 0x6e5   : > { %v1233_v53 = vpop.f32.mrf.mxu3 }
 0x756   : > { %v1238_v54 = vpop.xlane.xlu0 %1237 }
 0x757   : > { %v1239_v55 = vmul.f32 %v1238_v54, %v1125_v15 }
 0x759   : > { %v1240_v56 = vsub.f32 %v1235_v51, %v1239_v55 }
 0x75b   : > { %v1241_v57 = vmul.f32 %v1240_v56, %v1240_v56 }
 0x75d   : > { %v1242_v58 = vsel %vm558_vm1, %v1241_v57, 0.0 }
 0x75e   : > { %1243 = vadd.xlane.f32.xlu1 %v1242_v58 }
 0x7d1   : > { %v1244_v59 = vpop.xlane.xlu1 %1243 }
 0x7d2   : > { %v1245_v60 = vmul.f32 %v1244_v59, %v1125_v15 }
 0x7d4   : > { %v1246_v61 = vadd.f32 1e-05, %v1245_v60 }
 0x7d6   : > { %1805 = vrsqrt.f32 %v1246_v61  ;;  %vm1253_vm3 = vweird.f32 %v1246_v61 }
 0x7dc   : > { %v1806_v62 = vpop.eup %1805 }
 0x7dd   : > { %v1248_v63 = vmul.f32 %v1806_v62, %v1246_v61  ;;  %vm1254_vm2 = vweird.f32 %v1806_v62 }
 0x7de   : > { %vm1255_vm4 = vmor %vm1253_vm3, %vm1254_vm2 }
 0x7df   : > { %v1249_v0 = vmul.f32 %v1806_v62, %v1248_v63 }
 0x7e1   : > { %v1250_v1 = vmul.f32 0.5, %v1249_v0 }
 0x7e3   : > { %v1251_v2 = vsub.f32 1.5, %v1250_v1 }
 0x7e5   : > { %v1252_v13 = vmul.f32 %v1806_v62, %v1251_v2 }
 0x7e7   : > { %v1256_v6 = vsel %vm1255_vm4, %v1806_v62, %v1252_v13 }
 0x7e8   : > { %v1257_v8 = vmul.f32 %v1256_v6, %v1240_v56 }
 0x7ea   : > { %v1259_v9 = vmul.f32 %v1258_v4, %v1257_v8  ;;  %1266 = sbr.rel (%p1582_p10) target bundleno = 2173 (0x87d), region = 80 }
 0x7ec   : > { %v1261_v10 = vadd.f32 %v1260_v7, %v1259_v9 }
 0x7ee   : > { %1262 = vst.msk [vmem:[#allocation2] sm:$0xff] %vm558_vm1, %v1261_v10 }
 0x7ef   : > { %v1611_v11 = vld [vmem:[#allocation10 + $0x8] sm:$0xff]  ;;  %v1610_v12 = vld [vmem:[#allocation10] sm:$0xff]  ;;  %v1267_v14 = vpack.c.bf16 %v1261_v10, %v1261_v10 }
 0x7f0   : > { %1297 = vmatpush.bf16.msra.mxu0 %v1611_v11  ;;  %v1807_v5 = vld [vmem:[%s2617_s20] ss:$0 sm:$0xff] }
 0x7f4   : > { %1298 = vmatpush.bf16.msra.mxu0 %v1610_v12 }
 0x7f7   : > { %1591 = vmatmul.msk.bf16.vlgmr.msra.gmra.mxu0 %vm558_vm1, %v1267_v14 }
 0x874   : > { %v1300_v15 = vpop.f32.mrf.mxu0 }
 0x875   : > { %v1301_v16 = vadd.f32 %v1807_v5, %v1300_v15 }
 0x877   : > { %1304 = vst [vmem:[%s2370_s24] sm:$0xff] %v1301_v16 }
 0x87c   : > { %v1302_v17 = vpop.f32.mrf.mxu0 }
 0x87d PF: > { %s2618_s4 = sld [smem:[#allocation19_spill]]  ;;  %s1318_s27 = sshll.u32 %s2370_s24, 4  ;;  %s1319_s27 = int_to_ptr.vmem [resolvable:$true] %s1318_s27 }
 0x87e   : > { %s2620_s18 = sld [smem:[#allocation34_spill]]  ;;  %s1306_s22 = scalar_lea.sflag [#allocation6], %s2324_s8 }
 0x883   : > { %s1593_s3 = sshll.u32 %s2618_s4, 3 }
 0x884   : > { %s2621_s23 = smov %s2620_s18  ;;  %s1316_s1 = scalar_lea.hbm %s2620_s18, %s1593_s3 }
 0x885   : > { %s1320_s16 = sshll.u32 %s1316_s1, 4  ;;  %s1948_s5 = scalar_lea.hbm %s2621_s23, 16  ;;  %s1321_s16 = int_to_ptr.hbm [resolvable:$true] %s1320_s16 }
 0x886   : > { %s1942_s9 = sshra.s32 %s1321_s16, 4  ;;  %s1943_s9 = int_to_ptr.hbm [resolvable:$true] %s1942_s9 }
 0x887   : > { %s1944_s26 = scalar_lea.hbm %s1943_s9, 8  ;;  %p1949_p13 = scmp.lt.s32.totalorder %s1943_s9, %s2621_s23 }
 0x888   : > { %p1945_p0 = scmp.ne.s32.totalorder %s1943_s9, %s1944_s26  ;;  %p1950_p11 = scmp.lt.s32.totalorder %s1948_s5, %s1944_s26 }
 0x88a   : > { %p1946_p7 = pnand %p1945_p0, %p2224_p8  ;;  %p1951_p2 = por %p1950_p11, %p1949_p13 }
 0x88c   : > { %p1947_p12 = pneg %p1946_p7 }
 0x88e   : > { %p1952_p4 = pnand %p1951_p2, %p1947_p12 }
 0x890   : > { %1955 = shalt.err (!%p1952_p4)
}
 0x891   : > { %1622 = dma.vmem_to_hbm [thread:$0]  (%p2224_p8), %s1319_s27, 128, %s1321_s16, %s1306_s22  }
 0x892 PF: > { %s2622_s8 = sld [smem:[#allocation18_spill]]  ;;  %p1645_p1 = scmp.ge.s32.totalorder %s2062_s19, 2 }
 0x894   : > { %p1639_p5 = pnand %p1645_p1, %p2228_p9 }
 0x896   : > { %p1640_p6 = pneg %p1639_p5 }
 0x898   : > { %s1332_s17 = sand.u32 1, %s2622_s8  }
 0x899   : > { %s1333_s21 = scalar_lea.sflag [#allocation6], %s1332_s17 }
 0x89a   : > { %2017 = dma.done.wait (%p1640_p6), %s1333_s21, 128  }
 0x89b   : > { %2019 = vsyncadd (%p1640_p6), %s1333_s21, 4294967168  ;;  %s29_s19 = sadd.s32 1, %s2062_s19   ;;  %s2624_s20 = smov %s2303_s30 }
 0x89c   : > { %p26_p3 = scmp.ge.s32.totalorder %s29_s19, 6   ;;  %s2625_s15 = sld [smem:[#allocation20_spill]] }
 0x89d   : > { %s2626_s16 = sld [smem:[#allocation21_spill]]  ;;  %s2629_s30 = smov %s2026_s10 }
 0x89e   : > { %s2627_s17 = sld [smem:[#allocation24_spill]]  ;;  %s2630_s10 = smov %s2030_s11 }
 0x89f   : > { %s2628_s18 = sld [smem:[#allocation25_spill]]  ;;  %s2631_s11 = smov %s2624_s20 }
 0x8a0   : > { %s2632_s12 = smov %s2038_s13  ;;  %s2633_s13 = smov %s2042_s14 }
 0x8a1   : > { %s2634_s14 = smov %s2314_s0  ;;  %28 = sbr.rel (!%p26_p3) target bundleno = 22 (0x16), region = 149 }
 0x8a6   :  { %1339 = vsyncpa [#allocation5], 1 }
 0x8a7   :  { %1341 = vsyncpa [#allocation5 + $0x1], 1 }
 0x8a8   :  { %1342 = vsyncpa [#allocation8], 1 }
 0x8a9   :  { %1344 = vsyncpa [#allocation8 + $0x1], 1 }
 0x8aa   :  { %1345 = vsyncpa [#allocation11], 1 }
 0x8ab   :  { %1346 = vsyncpa [#allocation6], 1 }
 0x8ac   :  { %1348 = vsyncpa [#allocation6 + $0x1], 1 }

</bundles_post_ra>
